<compile_context>
chip_gen: v7x
topology: tpu7x:2x2x1
jax: 0.10.0
libtpu: 0.0.40
codegen_flags: <defaults>
</compile_context>

<pallas_src>
import functools

import jax
import jax.numpy as jnp
from jax.experimental import pallas as pl
from jax.experimental.pallas import tpu as pltpu

# ---------------- model hyper-parameters (small, synthetic) ----------------
B = 2            # batch
S = 8            # sequence length
H = 32           # hidden size
NH = 2           # attention heads
FF = 64          # FFN intermediate size
NLAYERS = 2      # encoder layers per tower
VOCAB_TEXT = 64
VOCAB_CODE = 80
LN_EPS = 1e-12

# order of the stacked per-tower weight operands fed to the fused kernel
WEIGHT_KEYS = ('emb_ln_g', 'emb_ln_b',
               'wqkv', 'bqkv', 'wo', 'bo', 'ln1_g', 'ln1_b',
               'w1', 'b1', 'w2', 'b2', 'ln2_g', 'ln2_b')


# ------------------------------ kernel helpers ------------------------------
def _layer_norm(x, g, b, eps=LN_EPS):
    mu = jnp.mean(x, axis=-1, keepdims=True)
    var = jnp.mean((x - mu) ** 2, axis=-1, keepdims=True)
    return (x - mu) * jax.lax.rsqrt(var + eps) * g + b


def _gelu(x):
    # tanh approximation of GELU
    c = jnp.float32(0.7978845608028654)  # sqrt(2/pi)
    return 0.5 * x * (1.0 + jnp.tanh(c * (x + 0.044715 * x * x * x)))


# ------------------------------ fused tower kernel ------------------------------
def tower_kernel(x_ref, bias_ref, eg_ref, eb_ref,
                 wqkv_ref, bqkv_ref, wo_ref, bo_ref, ln1g_ref, ln1b_ref,
                 w1_ref, b1_ref, w2_ref, b2_ref, ln2g_ref, ln2b_ref,
                 out_ref, *, num_heads, num_layers):
    """Whole encoder tower (emb LN + num_layers post-LN layers) for one tower.

    x_ref    : (1, B*S, H)  f32 embeddings (word + pos)
    bias_ref : (1, B*S, B*S) f32 additive attention bias
               (0 for same-batch valid keys, -1e9 for cross-batch / padding)
    weights  : stacked (1, NLAYERS, ...) per-layer params; matmul weights bf16
    out_ref  : (1, B*S, H) f32 last hidden states
    """
    x = x_ref[0].astype(jnp.float32)                  # (N, H), N = B*S
    bias = bias_ref[0]                                # (N, N)

    # Embedding LayerNorm (prologue of the fused tower).
    x = _layer_norm(x, eg_ref[0], eb_ref[0])

    n, h = x.shape
    dh = h // num_heads
    inv_sqrt_dh = jnp.float32(1.0 / (dh ** 0.5))

    for li in range(num_layers):                      # static unroll, NLAYERS=2
        xb = x.astype(jnp.bfloat16)

        # Fused QKV projection: one (N,H)x(H,3H) MXU matmul, one bias add.
        qkv = jnp.dot(xb, wqkv_ref[0, li],
                      preferred_element_type=jnp.float32) + bqkv_ref[0, li]
        q = qkv[:, 0:h] * inv_sqrt_dh                 # fold 1/sqrt(dh) into q
        k = qkv[:, h:2 * h]
        v = qkv[:, 2 * h:3 * h]

        # Per-head attention on static lane slices (no (S,NH,dh) reshape).
        ctx_parts = []
        for hd in range(num_heads):
            sl = slice(hd * dh, (hd + 1) * dh)
            s = jax.lax.dot_general(q[:, sl], k[:, sl],
                                    (((1,), (1,)), ((), ())),
                                    preferred_element_type=jnp.float32)
            s = s + bias                              # batch-block + padding mask
            s = s - jnp.max(s, axis=-1, keepdims=True)
            p = jnp.exp(s)
            p = p * pl.reciprocal(jnp.sum(p, axis=-1, keepdims=True),
                                  approx=True)
            ctx_parts.append(jnp.dot(p, v[:, sl],
                                     preferred_element_type=jnp.float32))
        ctx = jnp.concatenate(ctx_parts, axis=-1)     # (N, H)

        attn = jnp.dot(ctx.astype(jnp.bfloat16), wo_ref[0, li],
                       preferred_element_type=jnp.float32) + bo_ref[0, li]
        a = _layer_norm(x + attn, ln1g_ref[0, li], ln1b_ref[0, li])

        hmid = _gelu(jnp.dot(a.astype(jnp.bfloat16), w1_ref[0, li],
                             preferred_element_type=jnp.float32) + b1_ref[0, li])
        f = jnp.dot(hmid.astype(jnp.bfloat16), w2_ref[0, li],
                    preferred_element_type=jnp.float32) + b2_ref[0, li]
        x = _layer_norm(a + f, ln2g_ref[0, li], ln2b_ref[0, li])

    out_ref[0] = x.astype(out_ref.dtype)


# ------------------------------ pallas wrapper ------------------------------
def dual_tower_pallas(x_emb, bias, stacked):
    """x_emb: (T, B*S, H); bias: (T, B*S, B*S); stacked: dict of (T, ...) params."""
    t, n, h = x_emb.shape

    def per_tower_spec(arr):
        nd = arr.ndim - 1
        return pl.BlockSpec((1,) + arr.shape[1:],
                            lambda i, _nd=nd: (i,) + (0,) * _nd)

    operands = [x_emb, bias] + [stacked[key] for key in WEIGHT_KEYS]
    in_specs = [per_tower_spec(a) for a in operands]

    kern = functools.partial(tower_kernel, num_heads=NH, num_layers=NLAYERS)
    return pl.pallas_call(
        kern,
        out_shape=jax.ShapeDtypeStruct((t, n, h), jnp.float32),
        grid=(t,),
        in_specs=in_specs,
        out_specs=pl.BlockSpec((1, n, h), lambda i: (i, 0, 0)),
        # "parallel" tower axis -> the two independent towers split across the
        # two TensorCores on v7x (no effect on single-TC v5e/v6e).
        compiler_params=pltpu.CompilerParams(dimension_semantics=("parallel",)),
    )(*operands)


# ------------------------------ parameter init ------------------------------
def init_tower_params(key, vocab_size):
    def nrm(k, shape, scale=0.02, dtype=jnp.float32):
        return (scale * jax.random.normal(k, shape)).astype(dtype)

    keys = jax.random.split(key, 6)
    return {
        'word_emb': nrm(keys[0], (vocab_size, H)),
        'pos_emb': nrm(keys[1], (S, H)),
        'emb_ln_g': jnp.ones((1, H), jnp.float32),
        'emb_ln_b': jnp.zeros((1, H), jnp.float32),
        # fused QKV weight, bf16 for the MXU / halved weight DMA bytes
        'wqkv': nrm(keys[2], (NLAYERS, H, 3 * H), dtype=jnp.bfloat16),
        'bqkv': jnp.zeros((NLAYERS, 1, 3 * H), jnp.float32),
        'wo': nrm(keys[3], (NLAYERS, H, H), dtype=jnp.bfloat16),
        'bo': jnp.zeros((NLAYERS, 1, H), jnp.float32),
        'ln1_g': jnp.ones((NLAYERS, 1, H), jnp.float32),
        'ln1_b': jnp.zeros((NLAYERS, 1, H), jnp.float32),
        'w1': nrm(keys[4], (NLAYERS, H, FF), dtype=jnp.bfloat16),
        'b1': jnp.zeros((NLAYERS, 1, FF), jnp.float32),
        'w2': nrm(keys[5], (NLAYERS, FF, H), dtype=jnp.bfloat16),
        'b2': jnp.zeros((NLAYERS, 1, H), jnp.float32),
        'ln2_g': jnp.ones((NLAYERS, 1, H), jnp.float32),
        'ln2_b': jnp.zeros((NLAYERS, 1, H), jnp.float32),
    }


# ------------------------------ model forward ------------------------------
def make_attn_bias(mask, bsz, seq):
    """(B,S) 1/0 key mask -> (B*S, B*S) additive bias.

    0 where query and key belong to the same batch element AND the key is
    valid; -1e9 otherwise (handles both batch flattening and padding).
    """
    batch_idx = jnp.repeat(jnp.arange(bsz), seq)                  # (B*S,)
    same_batch = batch_idx[:, None] == batch_idx[None, :]
    key_valid = mask.reshape(-1)[None, :] > 0.5
    keep = jnp.logical_and(same_batch, key_valid)
    return jnp.where(keep, 0.0, -1e9).astype(jnp.float32)


@jax.jit
def bert_model_forward(params_text, params_code, stacked, ids, mask, ids_code):
    """Mirrors BERTModel.forward: returns (text[:,0,:], code[:,0,:])."""
    # Embedding gathers + positional embeddings (plain-JAX glue).
    emb_t = params_text['word_emb'][ids] + params_text['pos_emb'][None, :, :]
    emb_c = params_code['word_emb'][ids_code] + params_code['pos_emb'][None, :, :]
    bsz, seq, h = emb_t.shape

    x_emb = jnp.stack([emb_t.reshape(bsz * seq, h),
                       emb_c.reshape(bsz * seq, h)], axis=0).astype(jnp.float32)

    # Attention bias computed ONCE (hoisted out of all layers).
    bias_text = make_attn_bias(mask.astype(jnp.float32), bsz, seq)
    bias_code = make_attn_bias(jnp.ones((bsz, seq), jnp.float32), bsz, seq)
    bias = jnp.stack([bias_text, bias_code], axis=0)

    hidden = dual_tower_pallas(x_emb, bias, stacked)              # (2, B*S, H)
    hidden = hidden.reshape(2, bsz, seq, h)
    return hidden[0, :, 0, :], hidden[1, :, 0, :]                 # CLS tokens


# ----------------------------------- main -----------------------------------
if __name__ == "__main__":
    root = jax.random.PRNGKey(0)
    k_text_p, k_code_p, k_ids, k_ids_code = jax.random.split(root, 4)

    params_text = init_tower_params(k_text_p, VOCAB_TEXT)
    params_code = init_tower_params(k_code_p, VOCAB_CODE)
    # Stack the two towers' (identically shaped) encoder weights along a
    # leading "tower" axis so one pallas_call handles the whole model.
    stacked = {k: jnp.stack([params_text[k], params_code[k]], axis=0)
               for k in WEIGHT_KEYS}

    ids = jax.random.randint(k_ids, (B, S), 0, VOCAB_TEXT, dtype=jnp.int32)
    ids_code = jax.random.randint(k_ids_code, (B, S), 0, VOCAB_CODE, dtype=jnp.int32)
    # attention mask: first example fully valid, second padded after 5 tokens
    lengths = jnp.array([S, 5], dtype=jnp.int32)
    mask = (jnp.arange(S)[None, :] < lengths[:, None]).astype(jnp.float32)

    text_cls, code_cls = bert_model_forward(params_text, params_code, stacked,
                                            ids, mask, ids_code)
    jax.block_until_ready((text_cls, code_cls))

    assert text_cls.shape == (B, H) and code_cls.shape == (B, H)
    assert bool(jnp.all(jnp.isfinite(text_cls)))
    assert bool(jnp.all(jnp.isfinite(code_cls)))
    print("KERNEL_OK")
</pallas_src>

<mosaic_0001>
module attributes {stable_mosaic.version = 11 : i64} {
  func.func @tower_kernel(%arg0: i32, %arg1: memref<1x16x32xf32, #tpu.memory_space<vmem>>, %arg2: memref<1x16x16xf32, #tpu.memory_space<vmem>>, %arg3: memref<1x1x32xf32, #tpu.memory_space<vmem>>, %arg4: memref<1x1x32xf32, #tpu.memory_space<vmem>>, %arg5: memref<1x2x32x96xbf16, #tpu.memory_space<vmem>>, %arg6: memref<1x2x1x96xf32, #tpu.memory_space<vmem>>, %arg7: memref<1x2x32x32xbf16, #tpu.memory_space<vmem>>, %arg8: memref<1x2x1x32xf32, #tpu.memory_space<vmem>>, %arg9: memref<1x2x1x32xf32, #tpu.memory_space<vmem>>, %arg10: memref<1x2x1x32xf32, #tpu.memory_space<vmem>>, %arg11: memref<1x2x32x64xbf16, #tpu.memory_space<vmem>>, %arg12: memref<1x2x1x64xf32, #tpu.memory_space<vmem>>, %arg13: memref<1x2x64x32xbf16, #tpu.memory_space<vmem>>, %arg14: memref<1x2x1x32xf32, #tpu.memory_space<vmem>>, %arg15: memref<1x2x1x32xf32, #tpu.memory_space<vmem>>, %arg16: memref<1x2x1x32xf32, #tpu.memory_space<vmem>>, %arg17: memref<1x16x32xf32, #tpu.memory_space<vmem>>) attributes {dimension_semantics = [#tpu.dimension_semantics<parallel>], iteration_bounds = array<i64: 2>, scalar_prefetch = 0 : i64, scratch_operands = 0 : i64, tpu.core_type = #tpu.core_type<tc>, window_params = [{transform_indices = @transform_0, window_bounds = array<i64: 1, 16, 32>}, {transform_indices = @transform_1, window_bounds = array<i64: 1, 16, 16>}, {transform_indices = @transform_2, window_bounds = array<i64: 1, 1, 32>}, {transform_indices = @transform_3, window_bounds = array<i64: 1, 1, 32>}, {transform_indices = @transform_4, window_bounds = array<i64: 1, 2, 32, 96>}, {transform_indices = @transform_5, window_bounds = array<i64: 1, 2, 1, 96>}, {transform_indices = @transform_6, window_bounds = array<i64: 1, 2, 32, 32>}, {transform_indices = @transform_7, window_bounds = array<i64: 1, 2, 1, 32>}, {transform_indices = @transform_8, window_bounds = array<i64: 1, 2, 1, 32>}, {transform_indices = @transform_9, window_bounds = array<i64: 1, 2, 1, 32>}, {transform_indices = @transform_10, window_bounds = array<i64: 1, 2, 32, 64>}, {transform_indices = @transform_11, window_bounds = array<i64: 1, 2, 1, 64>}, {transform_indices = @transform_12, window_bounds = array<i64: 1, 2, 64, 32>}, {transform_indices = @transform_13, window_bounds = array<i64: 1, 2, 1, 32>}, {transform_indices = @transform_14, window_bounds = array<i64: 1, 2, 1, 32>}, {transform_indices = @transform_15, window_bounds = array<i64: 1, 2, 1, 32>}, {transform_indices = @transform_16, window_bounds = array<i64: 1, 16, 32>}]} {
    %c0 = arith.constant 0 : index
    %c0_0 = arith.constant 0 : index
    %c0_1 = arith.constant 0 : index
    %0 = vector.load %arg1[%c0, %c0_0, %c0_1] : memref<1x16x32xf32, #tpu.memory_space<vmem>>, vector<1x16x32xf32>
    %1 = vector.shape_cast %0 : vector<1x16x32xf32> to vector<16x32xf32>
    %c0_2 = arith.constant 0 : index
    %c0_3 = arith.constant 0 : index
    %c0_4 = arith.constant 0 : index
    %2 = vector.load %arg2[%c0_2, %c0_3, %c0_4] : memref<1x16x16xf32, #tpu.memory_space<vmem>>, vector<1x16x16xf32>
    %3 = vector.shape_cast %2 : vector<1x16x16xf32> to vector<16x16xf32>
    %c0_5 = arith.constant 0 : index
    %c0_6 = arith.constant 0 : index
    %c0_7 = arith.constant 0 : index
    %4 = vector.load %arg3[%c0_5, %c0_6, %c0_7] : memref<1x1x32xf32, #tpu.memory_space<vmem>>, vector<1x1x32xf32>
    %5 = vector.shape_cast %4 : vector<1x1x32xf32> to vector<1x32xf32>
    %c0_8 = arith.constant 0 : index
    %c0_9 = arith.constant 0 : index
    %c0_10 = arith.constant 0 : index
    %6 = vector.load %arg4[%c0_8, %c0_9, %c0_10] : memref<1x1x32xf32, #tpu.memory_space<vmem>>, vector<1x1x32xf32>
    %7 = vector.shape_cast %6 : vector<1x1x32xf32> to vector<1x32xf32>
    %cst = arith.constant dense<0.000000e+00> : vector<16xf32>
    %8 = vector.multi_reduction <add>, %1, %cst [1] : vector<16x32xf32> to vector<16xf32>
    %9 = vector.shape_cast %8 : vector<16xf32> to vector<16x1xf32>
    %cst_11 = arith.constant 3.200000e+01 : f32
    %10 = vector.broadcast %cst_11 : f32 to vector<16x1xf32>
    %11 = arith.divf %9, %10 : vector<16x1xf32>
    %12 = vector.broadcast %11 : vector<16x1xf32> to vector<16x32xf32>
    %13 = arith.subf %1, %12 : vector<16x32xf32>
    %14 = arith.mulf %13, %13 : vector<16x32xf32>
    %cst_12 = arith.constant dense<0.000000e+00> : vector<16xf32>
    %15 = vector.multi_reduction <add>, %14, %cst_12 [1] : vector<16x32xf32> to vector<16xf32>
    %16 = vector.shape_cast %15 : vector<16xf32> to vector<16x1xf32>
    %cst_13 = arith.constant 3.200000e+01 : f32
    %17 = vector.broadcast %cst_13 : f32 to vector<16x1xf32>
    %18 = arith.divf %16, %17 : vector<16x1xf32>
    %19 = vector.broadcast %11 : vector<16x1xf32> to vector<16x32xf32>
    %20 = arith.subf %1, %19 : vector<16x32xf32>
    %cst_14 = arith.constant 9.99999996E-13 : f32
    %21 = vector.broadcast %cst_14 : f32 to vector<16x1xf32>
    %22 = arith.addf %18, %21 : vector<16x1xf32>
    %23 = math.rsqrt %22 : vector<16x1xf32>
    %24 = vector.broadcast %23 : vector<16x1xf32> to vector<16x32xf32>
    %25 = arith.mulf %20, %24 : vector<16x32xf32>
    %26 = vector.broadcast %5 : vector<1x32xf32> to vector<16x32xf32>
    %27 = arith.mulf %25, %26 : vector<16x32xf32>
    %28 = vector.broadcast %7 : vector<1x32xf32> to vector<16x32xf32>
    %29 = arith.addf %27, %28 : vector<16x32xf32>
    %30 = arith.truncf %29 : vector<16x32xf32> to vector<16x32xbf16>
    %c0_15 = arith.constant 0 : index
    %c0_16 = arith.constant 0 : index
    %c0_17 = arith.constant 0 : index
    %c0_18 = arith.constant 0 : index
    %31 = vector.load %arg5[%c0_15, %c0_16, %c0_17, %c0_18] : memref<1x2x32x96xbf16, #tpu.memory_space<vmem>>, vector<1x1x32x96xbf16>
    %32 = vector.shape_cast %31 : vector<1x1x32x96xbf16> to vector<32x96xbf16>
    %cst_19 = arith.constant dense<0.000000e+00> : vector<16x96xf32>
    %33 = tpu.matmul %30, %32, %cst_19 {dimension_numbers = #tpu.dot_dimension_numbers<[1], [0], [0], [1], [0, 0, 1, 1], [], []>} : vector<16x32xbf16>, vector<32x96xbf16>, vector<16x96xf32> -> vector<16x96xf32>
    %c0_20 = arith.constant 0 : index
    %c0_21 = arith.constant 0 : index
    %c0_22 = arith.constant 0 : index
    %c0_23 = arith.constant 0 : index
    %34 = vector.load %arg6[%c0_20, %c0_21, %c0_22, %c0_23] : memref<1x2x1x96xf32, #tpu.memory_space<vmem>>, vector<1x1x1x96xf32>
    %35 = vector.shape_cast %34 : vector<1x1x1x96xf32> to vector<1x96xf32>
    %36 = vector.broadcast %35 : vector<1x96xf32> to vector<16x96xf32>
    %37 = arith.addf %33, %36 : vector<16x96xf32>
    %38 = vector.extract_strided_slice %37 {offsets = [0, 0], sizes = [16, 32], strides = [1, 1]} : vector<16x96xf32> to vector<16x32xf32>
    %cst_24 = arith.constant 2.500000e-01 : f32
    %39 = vector.broadcast %cst_24 : f32 to vector<16x32xf32>
    %40 = arith.mulf %38, %39 : vector<16x32xf32>
    %41 = vector.extract_strided_slice %37 {offsets = [0, 32], sizes = [16, 32], strides = [1, 1]} : vector<16x96xf32> to vector<16x32xf32>
    %42 = vector.extract_strided_slice %37 {offsets = [0, 64], sizes = [16, 32], strides = [1, 1]} : vector<16x96xf32> to vector<16x32xf32>
    %43 = vector.extract_strided_slice %40 {offsets = [0, 0], sizes = [16, 16], strides = [1, 1]} : vector<16x32xf32> to vector<16x16xf32>
    %44 = vector.extract_strided_slice %41 {offsets = [0, 0], sizes = [16, 16], strides = [1, 1]} : vector<16x32xf32> to vector<16x16xf32>
    %cst_25 = arith.constant dense<0.000000e+00> : vector<16x16xf32>
    %45 = tpu.matmul %43, %44, %cst_25 {dimension_numbers = #tpu.dot_dimension_numbers<[1], [1], [0], [0], [0, 0, 1, 0], [], []>} : vector<16x16xf32>, vector<16x16xf32>, vector<16x16xf32> -> vector<16x16xf32>
    %46 = arith.addf %45, %3 : vector<16x16xf32>
    %cst_26 = arith.constant dense<0xFF800000> : vector<16xf32>
    %47 = vector.multi_reduction <maximumf>, %46, %cst_26 [1] : vector<16x16xf32> to vector<16xf32>
    %48 = vector.shape_cast %47 : vector<16xf32> to vector<16x1xf32>
    %49 = vector.broadcast %48 : vector<16x1xf32> to vector<16x16xf32>
    %50 = arith.subf %46, %49 : vector<16x16xf32>
    %51 = math.exp %50 : vector<16x16xf32>
    %cst_27 = arith.constant dense<0.000000e+00> : vector<16xf32>
    %52 = vector.multi_reduction <add>, %51, %cst_27 [1] : vector<16x16xf32> to vector<16xf32>
    %53 = vector.shape_cast %52 : vector<16xf32> to vector<16x1xf32>
    %54 = tpu.reciprocal %53 {approx = true} : vector<16x1xf32> -> vector<16x1xf32>
    %55 = vector.broadcast %54 : vector<16x1xf32> to vector<16x16xf32>
    %56 = arith.mulf %51, %55 : vector<16x16xf32>
    %57 = vector.extract_strided_slice %42 {offsets = [0, 0], sizes = [16, 16], strides = [1, 1]} : vector<16x32xf32> to vector<16x16xf32>
    %cst_28 = arith.constant dense<0.000000e+00> : vector<16x16xf32>
    %58 = tpu.matmul %56, %57, %cst_28 {dimension_numbers = #tpu.dot_dimension_numbers<[1], [0], [0], [1], [0, 0, 1, 1], [], []>} : vector<16x16xf32>, vector<16x16xf32>, vector<16x16xf32> -> vector<16x16xf32>
    %59 = vector.extract_strided_slice %40 {offsets = [0, 16], sizes = [16, 16], strides = [1, 1]} : vector<16x32xf32> to vector<16x16xf32>
    %60 = vector.extract_strided_slice %41 {offsets = [0, 16], sizes = [16, 16], strides = [1, 1]} : vector<16x32xf32> to vector<16x16xf32>
    %cst_29 = arith.constant dense<0.000000e+00> : vector<16x16xf32>
    %61 = tpu.matmul %59, %60, %cst_29 {dimension_numbers = #tpu.dot_dimension_numbers<[1], [1], [0], [0], [0, 0, 1, 0], [], []>} : vector<16x16xf32>, vector<16x16xf32>, vector<16x16xf32> -> vector<16x16xf32>
    %62 = arith.addf %61, %3 : vector<16x16xf32>
    %cst_30 = arith.constant dense<0xFF800000> : vector<16xf32>
    %63 = vector.multi_reduction <maximumf>, %62, %cst_30 [1] : vector<16x16xf32> to vector<16xf32>
    %64 = vector.shape_cast %63 : vector<16xf32> to vector<16x1xf32>
    %65 = vector.broadcast %64 : vector<16x1xf32> to vector<16x16xf32>
    %66 = arith.subf %62, %65 : vector<16x16xf32>
    %67 = math.exp %66 : vector<16x16xf32>
    %cst_31 = arith.constant dense<0.000000e+00> : vector<16xf32>
    %68 = vector.multi_reduction <add>, %67, %cst_31 [1] : vector<16x16xf32> to vector<16xf32>
    %69 = vector.shape_cast %68 : vector<16xf32> to vector<16x1xf32>
    %70 = tpu.reciprocal %69 {approx = true} : vector<16x1xf32> -> vector<16x1xf32>
    %71 = vector.broadcast %70 : vector<16x1xf32> to vector<16x16xf32>
    %72 = arith.mulf %67, %71 : vector<16x16xf32>
    %73 = vector.extract_strided_slice %42 {offsets = [0, 16], sizes = [16, 16], strides = [1, 1]} : vector<16x32xf32> to vector<16x16xf32>
    %cst_32 = arith.constant dense<0.000000e+00> : vector<16x16xf32>
    %74 = tpu.matmul %72, %73, %cst_32 {dimension_numbers = #tpu.dot_dimension_numbers<[1], [0], [0], [1], [0, 0, 1, 1], [], []>} : vector<16x16xf32>, vector<16x16xf32>, vector<16x16xf32> -> vector<16x16xf32>
    %75 = tpu.concatenate %58, %74 in 1 : vector<16x16xf32>, vector<16x16xf32> -> vector<16x32xf32>
    %76 = arith.truncf %75 : vector<16x32xf32> to vector<16x32xbf16>
    %c0_33 = arith.constant 0 : index
    %c0_34 = arith.constant 0 : index
    %c0_35 = arith.constant 0 : index
    %c0_36 = arith.constant 0 : index
    %77 = vector.load %arg7[%c0_33, %c0_34, %c0_35, %c0_36] : memref<1x2x32x32xbf16, #tpu.memory_space<vmem>>, vector<1x1x32x32xbf16>
    %78 = vector.shape_cast %77 : vector<1x1x32x32xbf16> to vector<32x32xbf16>
    %cst_37 = arith.constant dense<0.000000e+00> : vector<16x32xf32>
    %79 = tpu.matmul %76, %78, %cst_37 {dimension_numbers = #tpu.dot_dimension_numbers<[1], [0], [0], [1], [0, 0, 1, 1], [], []>} : vector<16x32xbf16>, vector<32x32xbf16>, vector<16x32xf32> -> vector<16x32xf32>
    %c0_38 = arith.constant 0 : index
    %c0_39 = arith.constant 0 : index
    %c0_40 = arith.constant 0 : index
    %c0_41 = arith.constant 0 : index
    %80 = vector.load %arg8[%c0_38, %c0_39, %c0_40, %c0_41] : memref<1x2x1x32xf32, #tpu.memory_space<vmem>>, vector<1x1x1x32xf32>
    %81 = vector.shape_cast %80 : vector<1x1x1x32xf32> to vector<1x32xf32>
    %82 = vector.broadcast %81 : vector<1x32xf32> to vector<16x32xf32>
    %83 = arith.addf %79, %82 : vector<16x32xf32>
    %84 = arith.addf %29, %83 : vector<16x32xf32>
    %c0_42 = arith.constant 0 : index
    %c0_43 = arith.constant 0 : index
    %c0_44 = arith.constant 0 : index
    %c0_45 = arith.constant 0 : index
    %85 = vector.load %arg9[%c0_42, %c0_43, %c0_44, %c0_45] : memref<1x2x1x32xf32, #tpu.memory_space<vmem>>, vector<1x1x1x32xf32>
    %86 = vector.shape_cast %85 : vector<1x1x1x32xf32> to vector<1x32xf32>
    %c0_46 = arith.constant 0 : index
    %c0_47 = arith.constant 0 : index
    %c0_48 = arith.constant 0 : index
    %c0_49 = arith.constant 0 : index
    %87 = vector.load %arg10[%c0_46, %c0_47, %c0_48, %c0_49] : memref<1x2x1x32xf32, #tpu.memory_space<vmem>>, vector<1x1x1x32xf32>
    %88 = vector.shape_cast %87 : vector<1x1x1x32xf32> to vector<1x32xf32>
    %cst_50 = arith.constant dense<0.000000e+00> : vector<16xf32>
    %89 = vector.multi_reduction <add>, %84, %cst_50 [1] : vector<16x32xf32> to vector<16xf32>
    %90 = vector.shape_cast %89 : vector<16xf32> to vector<16x1xf32>
    %cst_51 = arith.constant 3.200000e+01 : f32
    %91 = vector.broadcast %cst_51 : f32 to vector<16x1xf32>
    %92 = arith.divf %90, %91 : vector<16x1xf32>
    %93 = vector.broadcast %92 : vector<16x1xf32> to vector<16x32xf32>
    %94 = arith.subf %84, %93 : vector<16x32xf32>
    %95 = arith.mulf %94, %94 : vector<16x32xf32>
    %cst_52 = arith.constant dense<0.000000e+00> : vector<16xf32>
    %96 = vector.multi_reduction <add>, %95, %cst_52 [1] : vector<16x32xf32> to vector<16xf32>
    %97 = vector.shape_cast %96 : vector<16xf32> to vector<16x1xf32>
    %cst_53 = arith.constant 3.200000e+01 : f32
    %98 = vector.broadcast %cst_53 : f32 to vector<16x1xf32>
    %99 = arith.divf %97, %98 : vector<16x1xf32>
    %100 = vector.broadcast %92 : vector<16x1xf32> to vector<16x32xf32>
    %101 = arith.subf %84, %100 : vector<16x32xf32>
    %cst_54 = arith.constant 9.99999996E-13 : f32
    %102 = vector.broadcast %cst_54 : f32 to vector<16x1xf32>
    %103 = arith.addf %99, %102 : vector<16x1xf32>
    %104 = math.rsqrt %103 : vector<16x1xf32>
    %105 = vector.broadcast %104 : vector<16x1xf32> to vector<16x32xf32>
    %106 = arith.mulf %101, %105 : vector<16x32xf32>
    %107 = vector.broadcast %86 : vector<1x32xf32> to vector<16x32xf32>
    %108 = arith.mulf %106, %107 : vector<16x32xf32>
    %109 = vector.broadcast %88 : vector<1x32xf32> to vector<16x32xf32>
    %110 = arith.addf %108, %109 : vector<16x32xf32>
    %111 = arith.truncf %110 : vector<16x32xf32> to vector<16x32xbf16>
    %c0_55 = arith.constant 0 : index
    %c0_56 = arith.constant 0 : index
    %c0_57 = arith.constant 0 : index
    %c0_58 = arith.constant 0 : index
    %112 = vector.load %arg11[%c0_55, %c0_56, %c0_57, %c0_58] : memref<1x2x32x64xbf16, #tpu.memory_space<vmem>>, vector<1x1x32x64xbf16>
    %113 = vector.shape_cast %112 : vector<1x1x32x64xbf16> to vector<32x64xbf16>
    %cst_59 = arith.constant dense<0.000000e+00> : vector<16x64xf32>
    %114 = tpu.matmul %111, %113, %cst_59 {dimension_numbers = #tpu.dot_dimension_numbers<[1], [0], [0], [1], [0, 0, 1, 1], [], []>} : vector<16x32xbf16>, vector<32x64xbf16>, vector<16x64xf32> -> vector<16x64xf32>
    %c0_60 = arith.constant 0 : index
    %c0_61 = arith.constant 0 : index
    %c0_62 = arith.constant 0 : index
    %c0_63 = arith.constant 0 : index
    %115 = vector.load %arg12[%c0_60, %c0_61, %c0_62, %c0_63] : memref<1x2x1x64xf32, #tpu.memory_space<vmem>>, vector<1x1x1x64xf32>
    %116 = vector.shape_cast %115 : vector<1x1x1x64xf32> to vector<1x64xf32>
    %117 = vector.broadcast %116 : vector<1x64xf32> to vector<16x64xf32>
    %118 = arith.addf %114, %117 : vector<16x64xf32>
    %cst_64 = arith.constant 5.000000e-01 : f32
    %119 = vector.broadcast %cst_64 : f32 to vector<16x64xf32>
    %120 = arith.mulf %119, %118 : vector<16x64xf32>
    %cst_65 = arith.constant 4.471500e-02 : f32
    %121 = vector.broadcast %cst_65 : f32 to vector<16x64xf32>
    %122 = arith.mulf %121, %118 : vector<16x64xf32>
    %123 = arith.mulf %122, %118 : vector<16x64xf32>
    %124 = arith.mulf %123, %118 : vector<16x64xf32>
    %125 = arith.addf %118, %124 : vector<16x64xf32>
    %cst_66 = arith.constant 0.797884583 : f32
    %126 = vector.broadcast %cst_66 : f32 to vector<16x64xf32>
    %127 = arith.mulf %126, %125 : vector<16x64xf32>
    %128 = math.tanh %127 : vector<16x64xf32>
    %cst_67 = arith.constant 1.000000e+00 : f32
    %129 = vector.broadcast %cst_67 : f32 to vector<16x64xf32>
    %130 = arith.addf %129, %128 : vector<16x64xf32>
    %131 = arith.mulf %120, %130 : vector<16x64xf32>
    %132 = arith.truncf %131 : vector<16x64xf32> to vector<16x64xbf16>
    %c0_68 = arith.constant 0 : index
    %c0_69 = arith.constant 0 : index
    %c0_70 = arith.constant 0 : index
    %c0_71 = arith.constant 0 : index
    %133 = vector.load %arg13[%c0_68, %c0_69, %c0_70, %c0_71] : memref<1x2x64x32xbf16, #tpu.memory_space<vmem>>, vector<1x1x64x32xbf16>
    %134 = vector.shape_cast %133 : vector<1x1x64x32xbf16> to vector<64x32xbf16>
    %cst_72 = arith.constant dense<0.000000e+00> : vector<16x32xf32>
    %135 = tpu.matmul %132, %134, %cst_72 {dimension_numbers = #tpu.dot_dimension_numbers<[1], [0], [0], [1], [0, 0, 1, 1], [], []>} : vector<16x64xbf16>, vector<64x32xbf16>, vector<16x32xf32> -> vector<16x32xf32>
    %c0_73 = arith.constant 0 : index
    %c0_74 = arith.constant 0 : index
    %c0_75 = arith.constant 0 : index
    %c0_76 = arith.constant 0 : index
    %136 = vector.load %arg14[%c0_73, %c0_74, %c0_75, %c0_76] : memref<1x2x1x32xf32, #tpu.memory_space<vmem>>, vector<1x1x1x32xf32>
    %137 = vector.shape_cast %136 : vector<1x1x1x32xf32> to vector<1x32xf32>
    %138 = vector.broadcast %137 : vector<1x32xf32> to vector<16x32xf32>
    %139 = arith.addf %135, %138 : vector<16x32xf32>
    %140 = arith.addf %110, %139 : vector<16x32xf32>
    %c0_77 = arith.constant 0 : index
    %c0_78 = arith.constant 0 : index
    %c0_79 = arith.constant 0 : index
    %c0_80 = arith.constant 0 : index
    %141 = vector.load %arg15[%c0_77, %c0_78, %c0_79, %c0_80] : memref<1x2x1x32xf32, #tpu.memory_space<vmem>>, vector<1x1x1x32xf32>
    %142 = vector.shape_cast %141 : vector<1x1x1x32xf32> to vector<1x32xf32>
    %c0_81 = arith.constant 0 : index
    %c0_82 = arith.constant 0 : index
    %c0_83 = arith.constant 0 : index
    %c0_84 = arith.constant 0 : index
    %143 = vector.load %arg16[%c0_81, %c0_82, %c0_83, %c0_84] : memref<1x2x1x32xf32, #tpu.memory_space<vmem>>, vector<1x1x1x32xf32>
    %144 = vector.shape_cast %143 : vector<1x1x1x32xf32> to vector<1x32xf32>
    %cst_85 = arith.constant dense<0.000000e+00> : vector<16xf32>
    %145 = vector.multi_reduction <add>, %140, %cst_85 [1] : vector<16x32xf32> to vector<16xf32>
    %146 = vector.shape_cast %145 : vector<16xf32> to vector<16x1xf32>
    %cst_86 = arith.constant 3.200000e+01 : f32
    %147 = vector.broadcast %cst_86 : f32 to vector<16x1xf32>
    %148 = arith.divf %146, %147 : vector<16x1xf32>
    %149 = vector.broadcast %148 : vector<16x1xf32> to vector<16x32xf32>
    %150 = arith.subf %140, %149 : vector<16x32xf32>
    %151 = arith.mulf %150, %150 : vector<16x32xf32>
    %cst_87 = arith.constant dense<0.000000e+00> : vector<16xf32>
    %152 = vector.multi_reduction <add>, %151, %cst_87 [1] : vector<16x32xf32> to vector<16xf32>
    %153 = vector.shape_cast %152 : vector<16xf32> to vector<16x1xf32>
    %cst_88 = arith.constant 3.200000e+01 : f32
    %154 = vector.broadcast %cst_88 : f32 to vector<16x1xf32>
    %155 = arith.divf %153, %154 : vector<16x1xf32>
    %156 = vector.broadcast %148 : vector<16x1xf32> to vector<16x32xf32>
    %157 = arith.subf %140, %156 : vector<16x32xf32>
    %cst_89 = arith.constant 9.99999996E-13 : f32
    %158 = vector.broadcast %cst_89 : f32 to vector<16x1xf32>
    %159 = arith.addf %155, %158 : vector<16x1xf32>
    %160 = math.rsqrt %159 : vector<16x1xf32>
    %161 = vector.broadcast %160 : vector<16x1xf32> to vector<16x32xf32>
    %162 = arith.mulf %157, %161 : vector<16x32xf32>
    %163 = vector.broadcast %142 : vector<1x32xf32> to vector<16x32xf32>
    %164 = arith.mulf %162, %163 : vector<16x32xf32>
    %165 = vector.broadcast %144 : vector<1x32xf32> to vector<16x32xf32>
    %166 = arith.addf %164, %165 : vector<16x32xf32>
    %167 = arith.truncf %166 : vector<16x32xf32> to vector<16x32xbf16>
    %c0_90 = arith.constant 0 : index
    %c1 = arith.constant 1 : index
    %c0_91 = arith.constant 0 : index
    %c0_92 = arith.constant 0 : index
    %168 = vector.load %arg5[%c0_90, %c1, %c0_91, %c0_92] : memref<1x2x32x96xbf16, #tpu.memory_space<vmem>>, vector<1x1x32x96xbf16>
    %169 = vector.shape_cast %168 : vector<1x1x32x96xbf16> to vector<32x96xbf16>
    %cst_93 = arith.constant dense<0.000000e+00> : vector<16x96xf32>
    %170 = tpu.matmul %167, %169, %cst_93 {dimension_numbers = #tpu.dot_dimension_numbers<[1], [0], [0], [1], [0, 0, 1, 1], [], []>} : vector<16x32xbf16>, vector<32x96xbf16>, vector<16x96xf32> -> vector<16x96xf32>
    %c0_94 = arith.constant 0 : index
    %c1_95 = arith.constant 1 : index
    %c0_96 = arith.constant 0 : index
    %c0_97 = arith.constant 0 : index
    %171 = vector.load %arg6[%c0_94, %c1_95, %c0_96, %c0_97] : memref<1x2x1x96xf32, #tpu.memory_space<vmem>>, vector<1x1x1x96xf32>
    %172 = vector.shape_cast %171 : vector<1x1x1x96xf32> to vector<1x96xf32>
    %173 = vector.broadcast %172 : vector<1x96xf32> to vector<16x96xf32>
    %174 = arith.addf %170, %173 : vector<16x96xf32>
    %175 = vector.extract_strided_slice %174 {offsets = [0, 0], sizes = [16, 32], strides = [1, 1]} : vector<16x96xf32> to vector<16x32xf32>
    %cst_98 = arith.constant 2.500000e-01 : f32
    %176 = vector.broadcast %cst_98 : f32 to vector<16x32xf32>
    %177 = arith.mulf %175, %176 : vector<16x32xf32>
    %178 = vector.extract_strided_slice %174 {offsets = [0, 32], sizes = [16, 32], strides = [1, 1]} : vector<16x96xf32> to vector<16x32xf32>
    %179 = vector.extract_strided_slice %174 {offsets = [0, 64], sizes = [16, 32], strides = [1, 1]} : vector<16x96xf32> to vector<16x32xf32>
    %180 = vector.extract_strided_slice %177 {offsets = [0, 0], sizes = [16, 16], strides = [1, 1]} : vector<16x32xf32> to vector<16x16xf32>
    %181 = vector.extract_strided_slice %178 {offsets = [0, 0], sizes = [16, 16], strides = [1, 1]} : vector<16x32xf32> to vector<16x16xf32>
    %cst_99 = arith.constant dense<0.000000e+00> : vector<16x16xf32>
    %182 = tpu.matmul %180, %181, %cst_99 {dimension_numbers = #tpu.dot_dimension_numbers<[1], [1], [0], [0], [0, 0, 1, 0], [], []>} : vector<16x16xf32>, vector<16x16xf32>, vector<16x16xf32> -> vector<16x16xf32>
    %183 = arith.addf %182, %3 : vector<16x16xf32>
    %cst_100 = arith.constant dense<0xFF800000> : vector<16xf32>
    %184 = vector.multi_reduction <maximumf>, %183, %cst_100 [1] : vector<16x16xf32> to vector<16xf32>
    %185 = vector.shape_cast %184 : vector<16xf32> to vector<16x1xf32>
    %186 = vector.broadcast %185 : vector<16x1xf32> to vector<16x16xf32>
    %187 = arith.subf %183, %186 : vector<16x16xf32>
    %188 = math.exp %187 : vector<16x16xf32>
    %cst_101 = arith.constant dense<0.000000e+00> : vector<16xf32>
    %189 = vector.multi_reduction <add>, %188, %cst_101 [1] : vector<16x16xf32> to vector<16xf32>
    %190 = vector.shape_cast %189 : vector<16xf32> to vector<16x1xf32>
    %191 = tpu.reciprocal %190 {approx = true} : vector<16x1xf32> -> vector<16x1xf32>
    %192 = vector.broadcast %191 : vector<16x1xf32> to vector<16x16xf32>
    %193 = arith.mulf %188, %192 : vector<16x16xf32>
    %194 = vector.extract_strided_slice %179 {offsets = [0, 0], sizes = [16, 16], strides = [1, 1]} : vector<16x32xf32> to vector<16x16xf32>
    %cst_102 = arith.constant dense<0.000000e+00> : vector<16x16xf32>
    %195 = tpu.matmul %193, %194, %cst_102 {dimension_numbers = #tpu.dot_dimension_numbers<[1], [0], [0], [1], [0, 0, 1, 1], [], []>} : vector<16x16xf32>, vector<16x16xf32>, vector<16x16xf32> -> vector<16x16xf32>
    %196 = vector.extract_strided_slice %177 {offsets = [0, 16], sizes = [16, 16], strides = [1, 1]} : vector<16x32xf32> to vector<16x16xf32>
    %197 = vector.extract_strided_slice %178 {offsets = [0, 16], sizes = [16, 16], strides = [1, 1]} : vector<16x32xf32> to vector<16x16xf32>
    %cst_103 = arith.constant dense<0.000000e+00> : vector<16x16xf32>
    %198 = tpu.matmul %196, %197, %cst_103 {dimension_numbers = #tpu.dot_dimension_numbers<[1], [1], [0], [0], [0, 0, 1, 0], [], []>} : vector<16x16xf32>, vector<16x16xf32>, vector<16x16xf32> -> vector<16x16xf32>
    %199 = arith.addf %198, %3 : vector<16x16xf32>
    %cst_104 = arith.constant dense<0xFF800000> : vector<16xf32>
    %200 = vector.multi_reduction <maximumf>, %199, %cst_104 [1] : vector<16x16xf32> to vector<16xf32>
    %201 = vector.shape_cast %200 : vector<16xf32> to vector<16x1xf32>
    %202 = vector.broadcast %201 : vector<16x1xf32> to vector<16x16xf32>
    %203 = arith.subf %199, %202 : vector<16x16xf32>
    %204 = math.exp %203 : vector<16x16xf32>
    %cst_105 = arith.constant dense<0.000000e+00> : vector<16xf32>
    %205 = vector.multi_reduction <add>, %204, %cst_105 [1] : vector<16x16xf32> to vector<16xf32>
    %206 = vector.shape_cast %205 : vector<16xf32> to vector<16x1xf32>
    %207 = tpu.reciprocal %206 {approx = true} : vector<16x1xf32> -> vector<16x1xf32>
    %208 = vector.broadcast %207 : vector<16x1xf32> to vector<16x16xf32>
    %209 = arith.mulf %204, %208 : vector<16x16xf32>
    %210 = vector.extract_strided_slice %179 {offsets = [0, 16], sizes = [16, 16], strides = [1, 1]} : vector<16x32xf32> to vector<16x16xf32>
    %cst_106 = arith.constant dense<0.000000e+00> : vector<16x16xf32>
    %211 = tpu.matmul %209, %210, %cst_106 {dimension_numbers = #tpu.dot_dimension_numbers<[1], [0], [0], [1], [0, 0, 1, 1], [], []>} : vector<16x16xf32>, vector<16x16xf32>, vector<16x16xf32> -> vector<16x16xf32>
    %212 = tpu.concatenate %195, %211 in 1 : vector<16x16xf32>, vector<16x16xf32> -> vector<16x32xf32>
    %213 = arith.truncf %212 : vector<16x32xf32> to vector<16x32xbf16>
    %c0_107 = arith.constant 0 : index
    %c1_108 = arith.constant 1 : index
    %c0_109 = arith.constant 0 : index
    %c0_110 = arith.constant 0 : index
    %214 = vector.load %arg7[%c0_107, %c1_108, %c0_109, %c0_110] : memref<1x2x32x32xbf16, #tpu.memory_space<vmem>>, vector<1x1x32x32xbf16>
    %215 = vector.shape_cast %214 : vector<1x1x32x32xbf16> to vector<32x32xbf16>
    %cst_111 = arith.constant dense<0.000000e+00> : vector<16x32xf32>
    %216 = tpu.matmul %213, %215, %cst_111 {dimension_numbers = #tpu.dot_dimension_numbers<[1], [0], [0], [1], [0, 0, 1, 1], [], []>} : vector<16x32xbf16>, vector<32x32xbf16>, vector<16x32xf32> -> vector<16x32xf32>
    %c0_112 = arith.constant 0 : index
    %c1_113 = arith.constant 1 : index
    %c0_114 = arith.constant 0 : index
    %c0_115 = arith.constant 0 : index
    %217 = vector.load %arg8[%c0_112, %c1_113, %c0_114, %c0_115] : memref<1x2x1x32xf32, #tpu.memory_space<vmem>>, vector<1x1x1x32xf32>
    %218 = vector.shape_cast %217 : vector<1x1x1x32xf32> to vector<1x32xf32>
    %219 = vector.broadcast %218 : vector<1x32xf32> to vector<16x32xf32>
    %220 = arith.addf %216, %219 : vector<16x32xf32>
    %221 = arith.addf %166, %220 : vector<16x32xf32>
    %c0_116 = arith.constant 0 : index
    %c1_117 = arith.constant 1 : index
    %c0_118 = arith.constant 0 : index
    %c0_119 = arith.constant 0 : index
    %222 = vector.load %arg9[%c0_116, %c1_117, %c0_118, %c0_119] : memref<1x2x1x32xf32, #tpu.memory_space<vmem>>, vector<1x1x1x32xf32>
    %223 = vector.shape_cast %222 : vector<1x1x1x32xf32> to vector<1x32xf32>
    %c0_120 = arith.constant 0 : index
    %c1_121 = arith.constant 1 : index
    %c0_122 = arith.constant 0 : index
    %c0_123 = arith.constant 0 : index
    %224 = vector.load %arg10[%c0_120, %c1_121, %c0_122, %c0_123] : memref<1x2x1x32xf32, #tpu.memory_space<vmem>>, vector<1x1x1x32xf32>
    %225 = vector.shape_cast %224 : vector<1x1x1x32xf32> to vector<1x32xf32>
    %cst_124 = arith.constant dense<0.000000e+00> : vector<16xf32>
    %226 = vector.multi_reduction <add>, %221, %cst_124 [1] : vector<16x32xf32> to vector<16xf32>
    %227 = vector.shape_cast %226 : vector<16xf32> to vector<16x1xf32>
    %cst_125 = arith.constant 3.200000e+01 : f32
    %228 = vector.broadcast %cst_125 : f32 to vector<16x1xf32>
    %229 = arith.divf %227, %228 : vector<16x1xf32>
    %230 = vector.broadcast %229 : vector<16x1xf32> to vector<16x32xf32>
    %231 = arith.subf %221, %230 : vector<16x32xf32>
    %232 = arith.mulf %231, %231 : vector<16x32xf32>
    %cst_126 = arith.constant dense<0.000000e+00> : vector<16xf32>
    %233 = vector.multi_reduction <add>, %232, %cst_126 [1] : vector<16x32xf32> to vector<16xf32>
    %234 = vector.shape_cast %233 : vector<16xf32> to vector<16x1xf32>
    %cst_127 = arith.constant 3.200000e+01 : f32
    %235 = vector.broadcast %cst_127 : f32 to vector<16x1xf32>
    %236 = arith.divf %234, %235 : vector<16x1xf32>
    %237 = vector.broadcast %229 : vector<16x1xf32> to vector<16x32xf32>
    %238 = arith.subf %221, %237 : vector<16x32xf32>
    %cst_128 = arith.constant 9.99999996E-13 : f32
    %239 = vector.broadcast %cst_128 : f32 to vector<16x1xf32>
    %240 = arith.addf %236, %239 : vector<16x1xf32>
    %241 = math.rsqrt %240 : vector<16x1xf32>
    %242 = vector.broadcast %241 : vector<16x1xf32> to vector<16x32xf32>
    %243 = arith.mulf %238, %242 : vector<16x32xf32>
    %244 = vector.broadcast %223 : vector<1x32xf32> to vector<16x32xf32>
    %245 = arith.mulf %243, %244 : vector<16x32xf32>
    %246 = vector.broadcast %225 : vector<1x32xf32> to vector<16x32xf32>
    %247 = arith.addf %245, %246 : vector<16x32xf32>
    %248 = arith.truncf %247 : vector<16x32xf32> to vector<16x32xbf16>
    %c0_129 = arith.constant 0 : index
    %c1_130 = arith.constant 1 : index
    %c0_131 = arith.constant 0 : index
    %c0_132 = arith.constant 0 : index
    %249 = vector.load %arg11[%c0_129, %c1_130, %c0_131, %c0_132] : memref<1x2x32x64xbf16, #tpu.memory_space<vmem>>, vector<1x1x32x64xbf16>
    %250 = vector.shape_cast %249 : vector<1x1x32x64xbf16> to vector<32x64xbf16>
    %cst_133 = arith.constant dense<0.000000e+00> : vector<16x64xf32>
    %251 = tpu.matmul %248, %250, %cst_133 {dimension_numbers = #tpu.dot_dimension_numbers<[1], [0], [0], [1], [0, 0, 1, 1], [], []>} : vector<16x32xbf16>, vector<32x64xbf16>, vector<16x64xf32> -> vector<16x64xf32>
    %c0_134 = arith.constant 0 : index
    %c1_135 = arith.constant 1 : index
    %c0_136 = arith.constant 0 : index
    %c0_137 = arith.constant 0 : index
    %252 = vector.load %arg12[%c0_134, %c1_135, %c0_136, %c0_137] : memref<1x2x1x64xf32, #tpu.memory_space<vmem>>, vector<1x1x1x64xf32>
    %253 = vector.shape_cast %252 : vector<1x1x1x64xf32> to vector<1x64xf32>
    %254 = vector.broadcast %253 : vector<1x64xf32> to vector<16x64xf32>
    %255 = arith.addf %251, %254 : vector<16x64xf32>
    %cst_138 = arith.constant 5.000000e-01 : f32
    %256 = vector.broadcast %cst_138 : f32 to vector<16x64xf32>
    %257 = arith.mulf %256, %255 : vector<16x64xf32>
    %cst_139 = arith.constant 4.471500e-02 : f32
    %258 = vector.broadcast %cst_139 : f32 to vector<16x64xf32>
    %259 = arith.mulf %258, %255 : vector<16x64xf32>
    %260 = arith.mulf %259, %255 : vector<16x64xf32>
    %261 = arith.mulf %260, %255 : vector<16x64xf32>
    %262 = arith.addf %255, %261 : vector<16x64xf32>
    %cst_140 = arith.constant 0.797884583 : f32
    %263 = vector.broadcast %cst_140 : f32 to vector<16x64xf32>
    %264 = arith.mulf %263, %262 : vector<16x64xf32>
    %265 = math.tanh %264 : vector<16x64xf32>
    %cst_141 = arith.constant 1.000000e+00 : f32
    %266 = vector.broadcast %cst_141 : f32 to vector<16x64xf32>
    %267 = arith.addf %266, %265 : vector<16x64xf32>
    %268 = arith.mulf %257, %267 : vector<16x64xf32>
    %269 = arith.truncf %268 : vector<16x64xf32> to vector<16x64xbf16>
    %c0_142 = arith.constant 0 : index
    %c1_143 = arith.constant 1 : index
    %c0_144 = arith.constant 0 : index
    %c0_145 = arith.constant 0 : index
    %270 = vector.load %arg13[%c0_142, %c1_143, %c0_144, %c0_145] : memref<1x2x64x32xbf16, #tpu.memory_space<vmem>>, vector<1x1x64x32xbf16>
    %271 = vector.shape_cast %270 : vector<1x1x64x32xbf16> to vector<64x32xbf16>
    %cst_146 = arith.constant dense<0.000000e+00> : vector<16x32xf32>
    %272 = tpu.matmul %269, %271, %cst_146 {dimension_numbers = #tpu.dot_dimension_numbers<[1], [0], [0], [1], [0, 0, 1, 1], [], []>} : vector<16x64xbf16>, vector<64x32xbf16>, vector<16x32xf32> -> vector<16x32xf32>
    %c0_147 = arith.constant 0 : index
    %c1_148 = arith.constant 1 : index
    %c0_149 = arith.constant 0 : index
    %c0_150 = arith.constant 0 : index
    %273 = vector.load %arg14[%c0_147, %c1_148, %c0_149, %c0_150] : memref<1x2x1x32xf32, #tpu.memory_space<vmem>>, vector<1x1x1x32xf32>
    %274 = vector.shape_cast %273 : vector<1x1x1x32xf32> to vector<1x32xf32>
    %275 = vector.broadcast %274 : vector<1x32xf32> to vector<16x32xf32>
    %276 = arith.addf %272, %275 : vector<16x32xf32>
    %277 = arith.addf %247, %276 : vector<16x32xf32>
    %c0_151 = arith.constant 0 : index
    %c1_152 = arith.constant 1 : index
    %c0_153 = arith.constant 0 : index
    %c0_154 = arith.constant 0 : index
    %278 = vector.load %arg15[%c0_151, %c1_152, %c0_153, %c0_154] : memref<1x2x1x32xf32, #tpu.memory_space<vmem>>, vector<1x1x1x32xf32>
    %279 = vector.shape_cast %278 : vector<1x1x1x32xf32> to vector<1x32xf32>
    %c0_155 = arith.constant 0 : index
    %c1_156 = arith.constant 1 : index
    %c0_157 = arith.constant 0 : index
    %c0_158 = arith.constant 0 : index
    %280 = vector.load %arg16[%c0_155, %c1_156, %c0_157, %c0_158] : memref<1x2x1x32xf32, #tpu.memory_space<vmem>>, vector<1x1x1x32xf32>
    %281 = vector.shape_cast %280 : vector<1x1x1x32xf32> to vector<1x32xf32>
    %cst_159 = arith.constant dense<0.000000e+00> : vector<16xf32>
    %282 = vector.multi_reduction <add>, %277, %cst_159 [1] : vector<16x32xf32> to vector<16xf32>
    %283 = vector.shape_cast %282 : vector<16xf32> to vector<16x1xf32>
    %cst_160 = arith.constant 3.200000e+01 : f32
    %284 = vector.broadcast %cst_160 : f32 to vector<16x1xf32>
    %285 = arith.divf %283, %284 : vector<16x1xf32>
    %286 = vector.broadcast %285 : vector<16x1xf32> to vector<16x32xf32>
    %287 = arith.subf %277, %286 : vector<16x32xf32>
    %288 = arith.mulf %287, %287 : vector<16x32xf32>
    %cst_161 = arith.constant dense<0.000000e+00> : vector<16xf32>
    %289 = vector.multi_reduction <add>, %288, %cst_161 [1] : vector<16x32xf32> to vector<16xf32>
    %290 = vector.shape_cast %289 : vector<16xf32> to vector<16x1xf32>
    %cst_162 = arith.constant 3.200000e+01 : f32
    %291 = vector.broadcast %cst_162 : f32 to vector<16x1xf32>
    %292 = arith.divf %290, %291 : vector<16x1xf32>
    %293 = vector.broadcast %285 : vector<16x1xf32> to vector<16x32xf32>
    %294 = arith.subf %277, %293 : vector<16x32xf32>
    %cst_163 = arith.constant 9.99999996E-13 : f32
    %295 = vector.broadcast %cst_163 : f32 to vector<16x1xf32>
    %296 = arith.addf %292, %295 : vector<16x1xf32>
    %297 = math.rsqrt %296 : vector<16x1xf32>
    %298 = vector.broadcast %297 : vector<16x1xf32> to vector<16x32xf32>
    %299 = arith.mulf %294, %298 : vector<16x32xf32>
    %300 = vector.broadcast %279 : vector<1x32xf32> to vector<16x32xf32>
    %301 = arith.mulf %299, %300 : vector<16x32xf32>
    %302 = vector.broadcast %281 : vector<1x32xf32> to vector<16x32xf32>
    %303 = arith.addf %301, %302 : vector<16x32xf32>
    %c0_164 = arith.constant 0 : index
    %c0_165 = arith.constant 0 : index
    %c0_166 = arith.constant 0 : index
    %304 = vector.load %arg17[%c0_164, %c0_165, %c0_166] : memref<1x16x32xf32, #tpu.memory_space<vmem>>, vector<1x16x32xf32>
    %305 = vector.shape_cast %304 : vector<1x16x32xf32> to vector<16x32xf32>
    %306 = vector.shape_cast %303 : vector<16x32xf32> to vector<1x16x32xf32>
    tpu.vector_store %arg17[%c0_164, %c0_165, %c0_166], %306 {strides = array<i32>} : memref<1x16x32xf32, #tpu.memory_space<vmem>>, vector<1x16x32xf32>,
    return
  }
  func.func @transform_0(%arg0: i32) -> (i32, i32, i32) {
    %c0_i32 = arith.constant 0 : i32
    %c0_i32_0 = arith.constant 0 : i32
    %c0_i32_1 = arith.constant 0 : i32
    return %arg0, %c0_i32, %c0_i32_0 : i32, i32, i32
  }
  func.func @transform_1(%arg0: i32) -> (i32, i32, i32) {
    %c0_i32 = arith.constant 0 : i32
    %c0_i32_0 = arith.constant 0 : i32
    %c0_i32_1 = arith.constant 0 : i32
    return %arg0, %c0_i32, %c0_i32_0 : i32, i32, i32
  }
  func.func @transform_2(%arg0: i32) -> (i32, i32, i32) {
    %c0_i32 = arith.constant 0 : i32
    %c0_i32_0 = arith.constant 0 : i32
    %c0_i32_1 = arith.constant 0 : i32
    return %arg0, %c0_i32, %c0_i32_0 : i32, i32, i32
  }
  func.func @transform_3(%arg0: i32) -> (i32, i32, i32) {
    %c0_i32 = arith.constant 0 : i32
    %c0_i32_0 = arith.constant 0 : i32
    %c0_i32_1 = arith.constant 0 : i32
    return %arg0, %c0_i32, %c0_i32_0 : i32, i32, i32
  }
  func.func @transform_4(%arg0: i32) -> (i32, i32, i32, i32) {
    %c0_i32 = arith.constant 0 : i32
    %c0_i32_0 = arith.constant 0 : i32
    %c0_i32_1 = arith.constant 0 : i32
    %c0_i32_2 = arith.constant 0 : i32
    return %arg0, %c0_i32, %c0_i32_0, %c0_i32_1 : i32, i32, i32, i32
  }
  func.func @transform_5(%arg0: i32) -> (i32, i32, i32, i32) {
    %c0_i32 = arith.constant 0 : i32
    %c0_i32_0 = arith.constant 0 : i32
    %c0_i32_1 = arith.constant 0 : i32
    %c0_i32_2 = arith.constant 0 : i32
    return %arg0, %c0_i32, %c0_i32_0, %c0_i32_1 : i32, i32, i32, i32
  }
  func.func @transform_6(%arg0: i32) -> (i32, i32, i32, i32) {
    %c0_i32 = arith.constant 0 : i32
    %c0_i32_0 = arith.constant 0 : i32
    %c0_i32_1 = arith.constant 0 : i32
    %c0_i32_2 = arith.constant 0 : i32
    return %arg0, %c0_i32, %c0_i32_0, %c0_i32_1 : i32, i32, i32, i32
  }
  func.func @transform_7(%arg0: i32) -> (i32, i32, i32, i32) {
    %c0_i32 = arith.constant 0 : i32
    %c0_i32_0 = arith.constant 0 : i32
    %c0_i32_1 = arith.constant 0 : i32
    %c0_i32_2 = arith.constant 0 : i32
    return %arg0, %c0_i32, %c0_i32_0, %c0_i32_1 : i32, i32, i32, i32
  }
  func.func @transform_8(%arg0: i32) -> (i32, i32, i32, i32) {
    %c0_i32 = arith.constant 0 : i32
    %c0_i32_0 = arith.constant 0 : i32
    %c0_i32_1 = arith.constant 0 : i32
    %c0_i32_2 = arith.constant 0 : i32
    return %arg0, %c0_i32, %c0_i32_0, %c0_i32_1 : i32, i32, i32, i32
  }
  func.func @transform_9(%arg0: i32) -> (i32, i32, i32, i32) {
    %c0_i32 = arith.constant 0 : i32
    %c0_i32_0 = arith.constant 0 : i32
    %c0_i32_1 = arith.constant 0 : i32
    %c0_i32_2 = arith.constant 0 : i32
    return %arg0, %c0_i32, %c0_i32_0, %c0_i32_1 : i32, i32, i32, i32
  }
  func.func @transform_10(%arg0: i32) -> (i32, i32, i32, i32) {
    %c0_i32 = arith.constant 0 : i32
    %c0_i32_0 = arith.constant 0 : i32
    %c0_i32_1 = arith.constant 0 : i32
    %c0_i32_2 = arith.constant 0 : i32
    return %arg0, %c0_i32, %c0_i32_0, %c0_i32_1 : i32, i32, i32, i32
  }
  func.func @transform_11(%arg0: i32) -> (i32, i32, i32, i32) {
    %c0_i32 = arith.constant 0 : i32
    %c0_i32_0 = arith.constant 0 : i32
    %c0_i32_1 = arith.constant 0 : i32
    %c0_i32_2 = arith.constant 0 : i32
    return %arg0, %c0_i32, %c0_i32_0, %c0_i32_1 : i32, i32, i32, i32
  }
  func.func @transform_12(%arg0: i32) -> (i32, i32, i32, i32) {
    %c0_i32 = arith.constant 0 : i32
    %c0_i32_0 = arith.constant 0 : i32
    %c0_i32_1 = arith.constant 0 : i32
    %c0_i32_2 = arith.constant 0 : i32
    return %arg0, %c0_i32, %c0_i32_0, %c0_i32_1 : i32, i32, i32, i32
  }
  func.func @transform_13(%arg0: i32) -> (i32, i32, i32, i32) {
    %c0_i32 = arith.constant 0 : i32
    %c0_i32_0 = arith.constant 0 : i32
    %c0_i32_1 = arith.constant 0 : i32
    %c0_i32_2 = arith.constant 0 : i32
    return %arg0, %c0_i32, %c0_i32_0, %c0_i32_1 : i32, i32, i32, i32
  }
  func.func @transform_14(%arg0: i32) -> (i32, i32, i32, i32) {
    %c0_i32 = arith.constant 0 : i32
    %c0_i32_0 = arith.constant 0 : i32
    %c0_i32_1 = arith.constant 0 : i32
    %c0_i32_2 = arith.constant 0 : i32
    return %arg0, %c0_i32, %c0_i32_0, %c0_i32_1 : i32, i32, i32, i32
  }
  func.func @transform_15(%arg0: i32) -> (i32, i32, i32, i32) {
    %c0_i32 = arith.constant 0 : i32
    %c0_i32_0 = arith.constant 0 : i32
    %c0_i32_1 = arith.constant 0 : i32
    %c0_i32_2 = arith.constant 0 : i32
    return %arg0, %c0_i32, %c0_i32_0, %c0_i32_1 : i32, i32, i32, i32
  }
  func.func @transform_16(%arg0: i32) -> (i32, i32, i32) {
    %c0_i32 = arith.constant 0 : i32
    %c0_i32_0 = arith.constant 0 : i32
    %c0_i32_1 = arith.constant 0 : i32
    return %arg0, %c0_i32, %c0_i32_0 : i32, i32, i32
  }
}

</mosaic_0001>

<bundles_post_ra>
// kernel: bert_model_forward.1
= control target key start
LH: loop header
LB: loop body
LE: loop exit
PB: predicated region body
PF: predicated region fallthrough
CT: control target
= control target key end

     0   :  { %s3311_s21 = smov 0   ;;  %s3634_s0 = inlined_call_operand.vmem [shape: f32[2,16,32], index: 0, kind: input, shape index: {}]   ;;  %s3635_s1 = inlined_call_operand.vmem [shape: f32[2,16,16], index: 1, kind: input, shape index: {}]   ;;  %s3636_s2 = inlined_call_operand.vmem [shape: f32[2,1,32], index: 2, kind: input, shape index: {}]   ;;  %s3637_s3 = inlined_call_operand.vmem [shape: f32[2,1,32], index: 3, kind: input, shape index: {}]   ;;  %s3638_s4 = inlined_call_operand.vmem [shape: bf16[2,2,32,96], index: 4, kind: input, shape index: {}]   ;;  %s3639_s5 = inlined_call_operand.vmem [shape: f32[2,2,1,96], index: 5, kind: input, shape index: {}]   ;;  %s3640_s6 = inlined_call_operand.vmem [shape: bf16[2,2,32,32], index: 6, kind: input, shape index: {}]   ;;  %s3641_s7 = inlined_call_operand.vmem [shape: f32[2,2,1,32], index: 7, kind: input, shape index: {}]   ;;  %s3642_s8 = inlined_call_operand.vmem [shape: f32[2,2,1,32], index: 8, kind: input, shape index: {}]   ;;  %s3643_s9 = inlined_call_operand.vmem [shape: f32[2,2,1,32], index: 9, kind: input, shape index: {}]   ;;  %s3644_s10 = inlined_call_operand.vmem [shape: bf16[2,2,32,64], index: 10, kind: input, shape index: {}]   ;;  %s3645_s11 = inlined_call_operand.vmem [shape: f32[2,2,1,64], index: 11, kind: input, shape index: {}]   ;;  %s3646_s12 = inlined_call_operand.vmem [shape: bf16[2,2,64,32], index: 12, kind: input, shape index: {}]   ;;  %s3647_s13 = inlined_call_operand.vmem [shape: f32[2,2,1,32], index: 13, kind: input, shape index: {}]   ;;  %s3648_s14 = inlined_call_operand.vmem [shape: f32[2,2,1,32], index: 14, kind: input, shape index: {}]   ;;  %s3649_s15 = inlined_call_operand.vmem [shape: f32[2,2,1,32], index: 15, kind: input, shape index: {}]   ;;  %s3650_s16 = inlined_call_operand.vmem [shape: f32[2,16,32], index: 16, kind: output, shape index: {}]  }
   0x1   :  { %3658 = sst [smem:[#allocation2_spill]] %s3634_s0 }
   0x2   :  { %3659 = sst [smem:[#allocation3_spill]] %s3635_s1 }
   0x3   :  { %3660 = sst [smem:[#allocation4_spill]] %s3636_s2 }
   0x4   :  { %3661 = sst [smem:[#allocation5_spill]] %s3637_s3 }
   0x5 LB: > { %s2702_s22 = sadd.s32 4294967295, %s3216_s21   ;;  %p2706_p0 = scmp.ge.s32.totalorder %s3216_s21, 1  ;;  %s3216_s21 = sphi %s3311_s21, %s26_s21  }
   0x6   : > { %p600_p1 = scmp.lt.s32.totalorder %s3216_s21, 3 }
   0x8   : > { %p601_p2 = pnand %p2706_p0, %p600_p1 }
   0x9   : > { %p713_p3 = scmp.lt.s32.totalorder (!%p601_p2), %s2702_s22, 1  ;;  %vm793_vm0 = vcmask (!%p601_p2), 261120   ;;  %s3662_s27 = sld [smem:[#allocation2_spill]] (!%p601_p2)  ;;  %v3218_v15 = vmov (!%p601_p2), 0.0   ;;  %vm3219_vm1 = vmmov (!%p601_p2), 0   ;;  %vm913_vm2 = vcmask (!%p601_p2), 130048  }
   0xa   : > { %604 = sbr.rel (%p601_p2) target bundleno = 5392 (0x1510), region = 84  ;;  %2896 = vmatprep.subr.bf16.mxu1 (!%p601_p2), %v3218_v15  ;;  %2900 = vmatprep.mubr.msk.bf16.mxu1 (!%p601_p2), %vm3219_vm1, %v3218_v15  ;;  %s3663_s2 = sld [smem:[#allocation4_spill]] (!%p601_p2)  ;;  %vm3396_vm3 = vmpackc.low (!%p601_p2), %vm913_vm2, %vm913_vm2  ;;  %vm1558_vm4 = vcmask (!%p601_p2), 523264  }
   0xb   : > { %s3664_s3 = sld [smem:[#allocation5_spill]] (!%p601_p2)  ;;  %s3654_s19 = smov (!%p601_p2), 112  }
   0xc   : > { %s3667_s1 = sld [smem:[#allocation3_spill]] (!%p601_p2)  ;;  %s3651_s30 = smov (!%p601_p2), 48  }
  0x11   : > { %s3675_s22 = smov (!%p713_p3, %s2702_s22), 1 }
  0x12   : > { %s3322_s23 = sshll.u32 %s3675_s22, 4  ;;  %s2834_s24 = sshll.u32 %s3675_s22, 6 }
  0x13   : > { %s717_s28 = scalar_lea.vmem %s3662_s27, %s3322_s23  ;;  %s3332_s0 = scalar_lea.vmem %s3646_s12, %s2834_s24 }
  0x14   : > { %v787_v0 = vld [vmem:[%s717_s28] sm:$0xff]  ;;  %v788_v1 = vld [vmem:[%s717_s28 + $0x8] sm:$0xff]  ;;  %s2831_s17 = sshll.u32 %s3675_s22, 5  ;;  %s725_s18 = scalar_lea.vmem %s3663_s2, %s3675_s22 }
  0x15   : > { %v794_v2 = vsel %vm793_vm0, %v787_v0, 0.0  ;;  %v797_v3 = vsel %vm793_vm0, %v788_v1, 0.0  ;;  %s3342_s20 = scalar_lea.vmem %s3638_s4, %s2831_s17  ;;  %s3349_s26 = scalar_lea.vmem %s3640_s6, %s2831_s17  ;;  %v2729_v25 = vld [vmem:[%s725_s18] ss:$0 sm:$0xff] }
  0x16   : > { %795 = vadd.xlane.f32.xlu0 %v794_v2  ;;  %v3130_v14 = vld [vmem:[%s3342_s20] sm:$0xff]   ;;  %s3354_s29 = scalar_lea.vmem %s3644_s10, %s2831_s17  ;;  %v3131_v16 = vld [vmem:[%s3342_s20 + $0x8] sm:$0xff]   ;;  %s728_s25 = scalar_lea.vmem %s3664_s3, %s3675_s22 }
  0x17   : > { %2897 = vmatpush3.bf16.msra.mxu1 %v3130_v14  ;;  %v2730_v29 = vld [vmem:[%s728_s25] ss:$0 sm:$0xff]  ;;  %s3376_s27 = sshll.u32 %s3675_s22, 1  ;;  %s3657_s22 = smov 80  }
  0x18   : > { %2898 = vmatprep.subr.bf16.mxu1 %v3218_v15  ;;  %s3382_s17 = scalar_lea.vmem %s3639_s5, %s3376_s27  ;;  %s3656_s18 = smov 96  }
  0x19   : > { %v2731_v34 = vld [vmem:[%s3382_s17] ss:$0 sm:$0xff]  ;;  %s722_s28 = scalar_lea.vmem %s3667_s1, %s3322_s23  ;;  %s3652_s24 = smov 64  }
  0x1a   : > { %798 = vadd.xlane.f32.xlu0 %v797_v3  ;;  %v3418_v55 = vld [vmem:[%s722_s28 + $0x8] sm:$0xff]  ;;  %v3420_v56 = vld [vmem:[%s722_s28] sm:$0xff]  ;;  %s3653_s25 = smov 16   ;;  %s3522_s1 = scalar_lea.vmem %s3648_s14, %s3376_s27 }
  0x1b   : > { %2899 = vmatpush3.bf16.msra.mxu1 %v3131_v16  ;;  %s3529_s3 = scalar_lea.vmem %s3649_s15, %s3376_s27  ;;  %s3668_s2 = smov 80  }
  0x1c   : > { %s3670_s28 = smov 112  }
  0xa3   : > { %v796_v4 = vpop.xlane.xlu0 %795 }
  0xa4   : > { %v801_v5 = vmul.f32 0.03125, %v796_v4 }
  0xa6   : > { %v803_v6 = vsub.f32 %v787_v0, %v801_v5 }
  0xa7   : > { %v799_v7 = vpop.xlane.xlu0 %798 }
  0xa8   : > { %v802_v8 = vmul.f32 0.03125, %v799_v7  ;;  %v805_v9 = vmul.f32 %v803_v6, %v803_v6 }
  0xaa   : > { %v804_v10 = vsub.f32 %v788_v1, %v802_v8  ;;  %v807_v11 = vsel %vm793_vm0, %v805_v9, 0.0 }
  0xab   : > { %808 = vadd.xlane.f32.xlu1 %v807_v11 }
  0xac   : > { %v806_v12 = vmul.f32 %v804_v10, %v804_v10 }
  0xae   : > { %v810_v13 = vsel %vm793_vm0, %v806_v12, 0.0 }
  0xaf   : > { %811 = vadd.xlane.f32.xlu1 %v810_v13 }
 0x138   : > { %v809_v17 = vpop.xlane.xlu1 %808 }
 0x139   : > { %v813_v18 = vmul.f32 0.03125, %v809_v17 }
 0x13b   : > { %v815_v19 = vadd.f32 1e-12, %v813_v18 }
 0x13c   : > { %v812_v20 = vpop.xlane.xlu1 %811 }
 0x13d   : > { %3150 = vrsqrt.f32 %v815_v19  ;;  %v814_v21 = vmul.f32 0.03125, %v812_v20 }
 0x13f   : > { %v816_v22 = vadd.f32 1e-12, %v814_v21 }
 0x141   : > { %3152 = vrsqrt.f32 %v816_v22 }
 0x147   : > { %v3151_v23 = vpop.eup %3150 }
 0x148   : > { %v819_v24 = vmul.f32 %v3151_v23, %v803_v6 }
 0x14a   : > { %v827_v28 = vmul.f32 %v2729_v25, %v819_v24 }
 0x14b   : > { %v3153_v26 = vpop.eup %3152 }
 0x14c   : > { %v820_v27 = vmul.f32 %v3153_v26, %v804_v10  ;;  %v3368_v31 = vadd.f32 %v2730_v29, %v827_v28 }
 0x14e   : > { %v828_v30 = vmul.f32 %v2729_v25, %v820_v27 }
 0x150   : > { %v3370_v32 = vadd.f32 %v2730_v29, %v828_v30 }
 0x152   : > { %v837_v33 = vpack.c.bf16 %v3370_v32, %v3368_v31 }
 0x154   : > { %2901 = vmatmul.mubr.msk.bf16.vlgmr.msra.gmra.mrb[0].mxu1 %vm793_vm0, %v837_v33 }
 0x227   : > { %v898_v35 = vpop.f32.mrb[0].mxu1 }
 0x228   : > { %v899_v36 = vadd.f32 %v2731_v34, %v898_v35  ;;  %v2902_v37 = vpop.f32.mrb[1].mxu1 }
 0x229   : > { %v901_v38 = vpop.f32.mrb[2].mxu1 }
 0x22a   : > { %v902_v39 = vadd.f32 %v2731_v34, %v901_v38  ;;  %v2903_v40 = vpop.f32.mrb[3].mxu1  ;;  %v905_v41 = vmul.f32 0.25, %v899_v36 }
 0x22c   : > { %2908 = vmatprep.mubr.msk.f32.mxu1 %vm913_vm2, %v905_v41  ;;  %v3386_v42 = vpack.i.bf16 %v902_v39, %v899_v36  ;;  %v906_v43 = vmul.f32 0.25, %v902_v39 }
 0x22e   : > { %3086 = vrot.lane.b32.xlu1 %v3386_v42, %s3657_s22  ;;  %3081 = vrot.lane.b32.xlu0 %v3386_v42, %s3656_s18  ;;  %s3483_s22 = scalar_lea.vmem %s3643_s9, %s3376_s27  ;;  %s3672_s18 = smov 48  }
 0x232   : > { %1108 = vrot.lane.b32.xlu1 %v905_v41, %s3654_s19 }
 0x236   : > { %1110 = vrot.lane.b32.xlu1 %v906_v43, %s3654_s19  ;;  %s3508_s19 = scalar_lea.vmem %s3647_s13, %s3376_s27 }
 0x2a0   : > { %v3087_v44 = vpop.permute.xlu1 %3086  ;;  %v3082_v45 = vpop.permute.xlu0 %3081 }
 0x2a1   : > { %v3089_v46 = vunpack.i.h.bf16 %v3087_v44  ;;  %v3088_v47 = vunpack.i.l.bf16 %v3087_v44  ;;  %v3084_v48 = vunpack.i.h.bf16 %v3082_v45  ;;  %v3083_v49 = vunpack.i.l.bf16 %v3082_v45 }
 0x2a3   : > { %v3024_v51 = vpack.c.bf16 %v3084_v48, %v3083_v49  ;;  %v3034_v52 = vpack.c.bf16 %v3089_v46, %v3088_v47  ;;  %v3132_v48 = vld [vmem:[%s3349_s26] sm:$0xff]   ;;  %v3133_v49 = vld [vmem:[%s3349_s26 + $0x8] sm:$0xff]  }
 0x2a4   : > { %v1109_v53 = vpop.permute.xlu1 %1108 }
 0x2a5   : > { %3026 = vmatprep.subr.msk.bf16.mxu1 %vm3396_vm3, %v3024_v51  ;;  %3036 = vmatprep.subr.msk.bf16.mxu0 %vm3396_vm3, %v3034_v52 }
 0x2a6   : > { %2922 = vmatprep.mubr.msk.f32.mxu0 %vm913_vm2, %v1109_v53  ;;  %3029 = vmatpush3.bf16.xpose.msk.msra.mxu1 %vm3396_vm3, %v3024_v51 }
 0x2a7   : > { %3039 = vmatpush3.bf16.xpose.msk.msra.mxu0 %vm3396_vm3, %v3034_v52 }
 0x2a8   : > { %2932 = vmatprep.subr.bf16.mxu0 %v3218_v15  ;;  %v1111_v54 = vpop.permute.xlu1 %1110 }
 0x2ad   : > { %2909 = vmatmul.mubr.msk.f32.vlgmr.msra.gmra.mrb[4].mxu1 %vm913_vm2, %v906_v43 }
 0x2ae   : > { %2923 = vmatmul.mubr.msk.f32.vlgmr.msra.gmra.mrb[0].mxu0 %vm913_vm2, %v1111_v54 }
 0x2af   : > { %2936 = vmatprep.mubr.msk.bf16.mxu0 %vm3219_vm1, %v3218_v15  ;;  %2933 = vmatpush3.bf16.msra.mxu0 %v3132_v48 }
 0x2b0   : > { %2934 = vmatprep.subr.bf16.mxu0 %v3218_v15 }
 0x2b3   : > { %2935 = vmatpush3.bf16.msra.mxu0 %v3133_v49 }
 0x2b4   : > { %2948 = vmatprep.subr.bf16.mxu0 %v3218_v15 }
 0x380   : > { %v2910_v57 = vpop.f32.mrb[4].mxu1 }
 0x381   : > { %v996_v58 = vadd.f32 %v2910_v57, %v3418_v55  ;;  %v2924_v59 = vpop.f32.mrb[0].mxu0  ;;  %v990_v60 = vpop.f32.mrb[5].mxu1 }
 0x382   : > { %v991_v61 = vadd.f32 %v990_v60, %v3420_v56  ;;  %v1190_v62 = vpop.f32.mrb[1].mxu0  ;;  %v1196_v2 = vadd.f32 %v2924_v59, %v3418_v55 }
 0x383   : > { %v1002_v63 = vsel %vm913_vm2, %v996_v58, -inf  ;;  %v1191_v0 = vadd.f32 %v1190_v62, %v3420_v56 }
 0x384   : > { %1003 = vmax.xlane.f32.xlu1 %v1002_v63  ;;  %v999_v1 = vsel %vm913_vm2, %v991_v61, -inf  ;;  %v1202_v4 = vsel %vm913_vm2, %v1196_v2, -inf }
 0x385   : > { %1000 = vmax.xlane.f32.xlu0 %v999_v1  ;;  %v1199_v3 = vsel %vm913_vm2, %v1191_v0, -inf }
 0x389   : > { %1200 = vmax.xlane.f32.xlu0 %v1199_v3 }
 0x38d   : > { %1203 = vmax.xlane.f32.xlu0 %v1202_v4 }
 0x411   : > { %v1004_v5 = vpop.xlane.xlu1 %1003 }
 0x412   : > { %v1006_v6 = vsub.f32 %v996_v58, %v1004_v5  ;;  %v1001_v7 = vpop.xlane.xlu0 %1000 }
 0x413   : > { %v1005_v8 = vsub.f32 %v991_v61, %v1001_v7 }
 0x414   : > { %v1009_v9 = vmul.f32 1.442695, %v1006_v6 }
 0x415   : > { %v1007_v10 = vmul.f32 1.442695, %v1005_v8 }
 0x416   : > { %3154 = vpow2.f32 %v1009_v9  ;;  %v1201_v11 = vpop.xlane.xlu0 %1200 }
 0x417   : > { %3156 = vpow2.f32 %v1007_v10  ;;  %v1205_v12 = vsub.f32 %v1191_v0, %v1201_v11 }
 0x419   : > { %v1207_v13 = vmul.f32 1.442695, %v1205_v12 }
 0x41a   : > { %v1204_v14 = vpop.xlane.xlu0 %1203 }
 0x41b   : > { %3158 = vpow2.f32 %v1207_v13  ;;  %v1206_v16 = vsub.f32 %v1196_v2, %v1204_v14 }
 0x41d   : > { %v1209_v17 = vmul.f32 1.442695, %v1206_v16 }
 0x41f   : > { %3160 = vpow2.f32 %v1209_v17 }
 0x420   : > { %v3155_v18 = vpop.eup %3154 }
 0x421   : > { %v3157_v19 = vpop.eup %3156  ;;  %v1014_v20 = vsel %vm913_vm2, %v3155_v18, 0.0 }
 0x422   : > { %1015 = vadd.xlane.f32.xlu1 %v1014_v20  ;;  %v1011_v21 = vsel %vm913_vm2, %v3157_v19, 0.0 }
 0x423   : > { %1012 = vadd.xlane.f32.xlu0 %v1011_v21  ;;  %v3135_v21 = vld [vmem:[%s3354_s29 + $0x8] sm:$0xff]  }
 0x425   : > { %v3159_v22 = vpop.eup %3158 }
 0x426   : > { %v1211_v23 = vsel %vm913_vm2, %v3159_v22, 0.0 }
 0x427   : > { %1212 = vadd.xlane.f32.xlu0 %v1211_v23 }
 0x429   : > { %v3161_v24 = vpop.eup %3160 }
 0x42a   : > { %v1214_v25 = vsel %vm913_vm2, %v3161_v24, 0.0 }
 0x42b   : > { %1215 = vadd.xlane.f32.xlu1 %v1214_v25 }
 0x43c   : > { %3096 = vrot.lane.b32.xlu1 %v3386_v42, %s3651_s30  ;;  %s3500_s30 = scalar_lea.vmem %s3645_s11, %s3376_s27 }
 0x43d   : > { %3091 = vrot.lane.b32.xlu0 %v3386_v42, %s3652_s24  ;;  %s3459_s24 = scalar_lea.vmem %s3641_s7, %s3376_s27 }
 0x43e   : > { %v2747_v0 = vld [vmem:[%s3459_s24] ss:$0 sm:$0xff] }
 0x4af   : > { %v1016_v26 = vpop.xlane.xlu1 %1015 }
 0x4b0   : > { %v1013_v27 = vpop.xlane.xlu0 %1012 }
 0x4b1   : > { %3162 = vrcp.f32 %v1013_v27 }
 0x4b2   : > { %3164 = vrcp.f32 %v1016_v26 }
 0x4b4   : > { %v1213_v28 = vpop.xlane.xlu0 %1212 }
 0x4b5   : > { %3166 = vrcp.f32 %v1213_v28 }
 0x4b8   : > { %v1216_v29 = vpop.xlane.xlu1 %1215  ;;  %v3092_v30 = vpop.permute.xlu0 %3091 }
 0x4b9   : > { %3168 = vrcp.f32 %v1216_v29  ;;  %v3094_v33 = vunpack.i.h.bf16 %v3092_v30  ;;  %v3093_v34 = vunpack.i.l.bf16 %v3092_v30 }
 0x4bb   : > { %v3163_v35 = vpop.eup %3162  ;;  %v3030_v36 = vpack.c.bf16 %v3094_v33, %v3093_v34 }
 0x4bc   : > { %v3165_v37 = vpop.eup %3164  ;;  %v3097_v38 = vpop.permute.xlu1 %3096  ;;  %v1019_v39 = vmul.f32 %v3163_v35, %v3157_v19 }
 0x4bd   : > { %v3099_v40 = vunpack.i.h.bf16 %v3097_v38  ;;  %v3098_v41 = vunpack.i.l.bf16 %v3097_v38  ;;  %3031 = vmatprep.subr.bf16.mxu1 %v3030_v36  ;;  %v1020_v43 = vmul.f32 %v3165_v37, %v3155_v18 }
 0x4be   : > { %3033 = vmatpush3.bf16.msra.mxu1 %v3030_v36  ;;  %2915 = vmatprep.mubr.msk.f32.mxu1 %vm913_vm2, %v1019_v39  ;;  %v2752_v36 = vld [vmem:[%s3483_s22] ss:$0 sm:$0xff] }
 0x4bf   : > { %v3167_v42 = vpop.eup %3166  ;;  %v3040_v44 = vpack.c.bf16 %v3099_v40, %v3098_v41  ;;  %v3136_v41 = vld [vmem:[%s3332_s0] sm:$0xff]  }
 0x4c0   : > { %v1219_v45 = vmul.f32 %v3167_v42, %v3159_v22  ;;  %v3137_v42 = vld [vmem:[%s3332_s0 + $0x8] sm:$0xff]  }
 0x4c1   : > { %2916 = vmatmul.mubr.msk.f32.vlgmr.msra.gmra.mrb[6].mxu1 %vm913_vm2, %v1020_v43  ;;  %3041 = vmatprep.subr.bf16.mxu1 %v3040_v44  ;;  %v3138_v43 = vld [vmem:[%s3332_s0 + $0x10] sm:$0xff]  }
 0x4c2   : > { %3043 = vmatpush3.bf16.msra.mxu1 %v3040_v44  ;;  %2929 = vmatprep.mubr.msk.f32.mxu1 %vm913_vm2, %v1219_v45  ;;  %v3139_v44 = vld [vmem:[%s3332_s0 + $0x18] sm:$0xff]   ;;  %v2753_v45 = vld [vmem:[%s3500_s30] ss:$0 sm:$0xff] }
 0x4c3   : > { %v3169_v46 = vpop.eup %3168  ;;  %2940 = vmatprep.subr.bf16.mxu1 %v3218_v15 }
 0x4c4   : > { %v1220_v47 = vmul.f32 %v3169_v46, %v3161_v24 }
 0x4c6   : > { %2930 = vmatmul.mubr.msk.f32.vlgmr.msra.gmra.mrb[8].mxu1 %vm913_vm2, %v1220_v47 }
 0x4c7   : > { %2944 = vmatprep.mubr.msk.bf16.mxu1 %vm3219_vm1, %v3218_v15 }
 0x594   : > { %v2917_v51 = vpop.f32.mrb[6].mxu1 }
 0x595   : > { %v1099_v52 = vpop.f32.mrb[7].mxu1 }
 0x599   : > { %v2931_v53 = vpop.f32.mrb[8].mxu1 }
 0x59a   : > { %v1299_v54 = vpop.f32.mrb[9].mxu1 }
 0x59b   : > { %v3100_v57 = vpack.i.bf16 %v2931_v53, %v1299_v54 }
 0x59d   : > { %3101 = vrot.lane.b32.xlu1 %v3100_v57, %s3653_s25  ;;  %s3476_s25 = scalar_lea.vmem %s3642_s8, %s3376_s27  ;;  %s3669_s27 = smov 96  }
 0x59e   : > { %v2751_v30 = vld [vmem:[%s3476_s25] ss:$0 sm:$0xff] }
 0x60f   : > { %v3102_v58 = vpop.permute.xlu1 %3101 }
 0x610   : > { %v3104_v59 = vunpack.i.h.bf16 %v3102_v58  ;;  %v3103_v60 = vunpack.i.l.bf16 %v3102_v58 }
 0x612   : > { %v1317_v61 = vsel %vm913_vm2, %v2917_v51, %v3104_v59  ;;  %v1316_v62 = vsel %vm913_vm2, %v1099_v52, %v3103_v60 }
 0x613   : > { %v1318_v63 = vpack.c.bf16 %v1317_v61, %v1316_v62 }
 0x615   : > { %2937 = vmatmul.mubr.msk.bf16.vlgmr.msra.gmra.mrb[4].mxu0 %vm793_vm0, %v1318_v63 }
 0x616   : > { %2956 = vmatprep.mubr.msk.bf16.mxu0 %vm3219_vm1, %v3218_v15  ;;  %2949 = vmatpush3.bf16.msra.mxu0 %v3136_v41  ;;  %v2763_v41 = vld [vmem:[%s3522_s1] ss:$0 sm:$0xff] }
 0x617   : > { %2950 = vmatprep.subr.bf16.mxu0 %v3218_v15 }
 0x61a   : > { %2951 = vmatpush3.bf16.msra.mxu0 %v3137_v42 }
 0x61b   : > { %2952 = vmatprep.subr.bf16.mxu0 %v3218_v15 }
 0x61e   : > { %2953 = vmatpush3.bf16.msra.mxu0 %v3138_v43 }
 0x61f   : > { %2954 = vmatprep.subr.bf16.mxu0 %v3218_v15 }
 0x622   : > { %2955 = vmatpush3.bf16.msra.mxu0 %v3139_v44 }
 0x6e8   : > { %v1379_v1 = vpop.f32.mrb[4].mxu0 }
 0x6e9   : > { %v1380_v2 = vadd.f32 %v2747_v0, %v1379_v1  ;;  %v2938_v3 = vpop.f32.mrb[5].mxu0 }
 0x6ea   : > { %v1382_v4 = vpop.f32.mrb[6].mxu0 }
 0x6eb   : > { %v1383_v5 = vadd.f32 %v2747_v0, %v1382_v4  ;;  %v2939_v6 = vpop.f32.mrb[7].mxu0  ;;  %v1386_v7 = vadd.f32 %v1380_v2, %v3368_v31 }
 0x6ed   : > { %v1390_v8 = vsel %vm793_vm0, %v1386_v7, 0.0  ;;  %v1387_v9 = vadd.f32 %v1383_v5, %v3370_v32  ;;  %v3134_v32 = vld [vmem:[%s3354_s29] sm:$0xff]  }
 0x6ee   : > { %1391 = vadd.xlane.f32.xlu1 %v1390_v8  ;;  %2941 = vmatpush3.bf16.msra.mxu1 %v3134_v32 }
 0x6ef   : > { %v1393_v10 = vsel %vm793_vm0, %v1387_v9, 0.0  ;;  %2942 = vmatprep.subr.bf16.mxu1 %v3218_v15 }
 0x6f0   : > { %1394 = vadd.xlane.f32.xlu0 %v1393_v10  ;;  %v2757_v10 = vld [vmem:[%s3508_s19] ss:$0 sm:$0xff] }
 0x6f2   : > { %2943 = vmatpush3.bf16.msra.mxu1 %v3135_v21 }
 0x6f3   : > { %2960 = vmatprep.subr.bf16.mxu1 %v3218_v15 }
 0x77b   : > { %v1392_v11 = vpop.xlane.xlu1 %1391 }
 0x77c   : > { %v1396_v12 = vmul.f32 0.03125, %v1392_v11 }
 0x77d   : > { %v1395_v13 = vpop.xlane.xlu0 %1394 }
 0x77e   : > { %v1398_v14 = vsub.f32 %v1386_v7, %v1396_v12  ;;  %v1397_v16 = vmul.f32 0.03125, %v1395_v13 }
 0x780   : > { %v1399_v17 = vsub.f32 %v1387_v9, %v1397_v16  ;;  %v1400_v18 = vmul.f32 %v1398_v14, %v1398_v14 }
 0x782   : > { %v1402_v19 = vsel %vm793_vm0, %v1400_v18, 0.0  ;;  %v1401_v31 = vmul.f32 %v1399_v17, %v1399_v17 }
 0x783   : > { %1403 = vadd.xlane.f32.xlu0 %v1402_v19 }
 0x784   : > { %v1405_v20 = vsel %vm793_vm0, %v1401_v31, 0.0 }
 0x787   : > { %1406 = vadd.xlane.f32.xlu0 %v1405_v20 }
 0x810   : > { %v1404_v22 = vpop.xlane.xlu0 %1403 }
 0x811   : > { %v1408_v23 = vmul.f32 0.03125, %v1404_v22 }
 0x813   : > { %v1410_v24 = vadd.f32 1e-12, %v1408_v23 }
 0x814   : > { %v1407_v25 = vpop.xlane.xlu0 %1406 }
 0x815   : > { %3170 = vrsqrt.f32 %v1410_v24  ;;  %v1409_v26 = vmul.f32 0.03125, %v1407_v25 }
 0x817   : > { %v1411_v27 = vadd.f32 1e-12, %v1409_v26 }
 0x819   : > { %3172 = vrsqrt.f32 %v1411_v27 }
 0x81f   : > { %v3171_v28 = vpop.eup %3170 }
 0x820   : > { %v1414_v29 = vmul.f32 %v3171_v28, %v1398_v14 }
 0x822   : > { %v1422_v34 = vmul.f32 %v2751_v30, %v1414_v29 }
 0x823   : > { %v3173_v33 = vpop.eup %3172 }
 0x824   : > { %v1415_v35 = vmul.f32 %v3173_v33, %v1399_v17  ;;  %v1430_v38 = vadd.f32 %v2752_v36, %v1422_v34  ;;  %v3141_v33 = vld [vmem:[%s3342_s20 + $0x18] sm:$0xff]  }
 0x826   : > { %v1423_v37 = vmul.f32 %v2751_v30, %v1415_v35  ;;  %v3140_v30 = vld [vmem:[%s3342_s20 + $0x10] sm:$0xff]   ;;  %s3673_s20 = smov 16  }
 0x828   : > { %v1431_v39 = vadd.f32 %v2752_v36, %v1423_v37 }
 0x82a   : > { %v1432_v40 = vpack.c.bf16 %v1431_v39, %v1430_v38 }
 0x82c   : > { %2945 = vmatmul.mubr.msk.bf16.vlgmr.msra.gmra.mrb[12].mxu1 %vm793_vm0, %v1432_v40 }
 0x82d   : > { %2964 = vmatprep.mubr.msk.bf16.mxu1 %vm3219_vm1, %v3218_v15  ;;  %2961 = vmatpush3.bf16.msra.mxu1 %v3140_v30 }
 0x82e   : > { %2962 = vmatprep.subr.bf16.mxu1 %v3218_v15 }
 0x831   : > { %2963 = vmatpush3.bf16.msra.mxu1 %v3141_v33 }
 0x8ff   : > { %v1493_v46 = vpop.f32.mrb[12].mxu1 }
 0x900   : > { %v1494_v47 = vadd.f32 %v2753_v45, %v1493_v46  ;;  %v2946_v48 = vpop.f32.mrb[13].mxu1  ;;  %v2764_v46 = vld [vmem:[%s3529_s3] ss:$0 sm:$0xff] }
 0x901   : > { %v1496_v49 = vpop.f32.mrb[14].mxu1 }
 0x902   : > { %v1502_v51 = vmul.f32 0.044715, %v1494_v47  ;;  %v1497_v52 = vadd.f32 %v2753_v45, %v1496_v49  ;;  %v2947_v53 = vpop.f32.mrb[15].mxu1  ;;  %v1500_v4 = vmul.f32 0.5, %v1494_v47 }
 0x904   : > { %v1504_v54 = vmul.f32 %v1502_v51, %v1494_v47  ;;  %v1503_v57 = vmul.f32 0.044715, %v1497_v52  ;;  %v1501_v5 = vmul.f32 0.5, %v1497_v52 }
 0x906   : > { %v1506_v58 = vmul.f32 %v1504_v54, %v1494_v47  ;;  %v1505_v59 = vmul.f32 %v1503_v57, %v1497_v52 }
 0x908   : > { %v1508_v60 = vadd.f32 %v1506_v58, %v1494_v47  ;;  %v1507_v61 = vmul.f32 %v1505_v59, %v1497_v52 }
 0x90a   : > { %v1510_v62 = vmul.f32 0.7978846, %v1508_v60  ;;  %v1509_v63 = vadd.f32 %v1507_v61, %v1497_v52  ;;  %v2770_v52 = vld [vmem:[%s3382_s17 + $0x1] ss:$0 sm:$0xff]  ;;  %s3671_s17 = smov 64  }
 0x90c   : > { %3174 = vtanh.f32 %v1510_v62  ;;  %v1511_v0 = vmul.f32 0.7978846, %v1509_v63 }
 0x90e   : > { %3176 = vtanh.f32 %v1511_v0 }
 0x916   : > { %v3175_v1 = vpop.eup %3174 }
 0x917   : > { %v1514_v2 = vadd.f32 1.0, %v3175_v1 }
 0x918   : > { %v3177_v3 = vpop.eup %3176 }
 0x919   : > { %v1515_v6 = vadd.f32 1.0, %v3177_v3  ;;  %v1516_v7 = vmul.f32 %v1514_v2, %v1500_v4 }
 0x91b   : > { %v1517_v8 = vmul.f32 %v1515_v6, %v1501_v5 }
 0x91d   : > { %v1518_v9 = vpack.c.bf16 %v1517_v8, %v1516_v7 }
 0x91f   : > { %2957 = vmatmul.mubr.msk.bf16.vlgmr.msra.gmra.mrb[8].mxu0 %vm1558_vm4, %v1518_v9 }
 0x9f2   : > { %v1596_v11 = vpop.f32.mrb[8].mxu0 }
 0x9f3   : > { %v1597_v12 = vadd.f32 %v2757_v10, %v1596_v11  ;;  %v2958_v13 = vpop.f32.mrb[9].mxu0 }
 0x9f4   : > { %v1599_v14 = vpop.f32.mrb[10].mxu0 }
 0x9f5   : > { %v1600_v16 = vadd.f32 %v2757_v10, %v1599_v14  ;;  %v2959_v17 = vpop.f32.mrb[11].mxu0  ;;  %v1603_v18 = vadd.f32 %v1597_v12, %v1430_v38 }
 0x9f7   : > { %v1607_v19 = vsel %vm793_vm0, %v1603_v18, 0.0  ;;  %v1604_v31 = vadd.f32 %v1600_v16, %v1431_v39 }
 0x9f8   : > { %1608 = vadd.xlane.f32.xlu1 %v1607_v19 }
 0x9f9   : > { %v1610_v20 = vsel %vm793_vm0, %v1604_v31, 0.0 }
 0x9fa   : > { %1611 = vadd.xlane.f32.xlu0 %v1610_v20 }
 0xa85   : > { %v1609_v32 = vpop.xlane.xlu1 %1608 }
 0xa86   : > { %v1613_v21 = vmul.f32 0.03125, %v1609_v32 }
 0xa87   : > { %v1612_v22 = vpop.xlane.xlu0 %1611 }
 0xa88   : > { %v1615_v23 = vsub.f32 %v1603_v18, %v1613_v21  ;;  %v1614_v24 = vmul.f32 0.03125, %v1612_v22 }
 0xa8a   : > { %v1616_v25 = vsub.f32 %v1604_v31, %v1614_v24  ;;  %v1617_v26 = vmul.f32 %v1615_v23, %v1615_v23 }
 0xa8c   : > { %v1619_v27 = vsel %vm793_vm0, %v1617_v26, 0.0  ;;  %v1618_v28 = vmul.f32 %v1616_v25, %v1616_v25 }
 0xa8d   : > { %1620 = vadd.xlane.f32.xlu1 %v1619_v27 }
 0xa8e   : > { %v1622_v29 = vsel %vm793_vm0, %v1618_v28, 0.0 }
 0xa8f   : > { %1623 = vadd.xlane.f32.xlu0 %v1622_v29 }
 0xb1a   : > { %v1621_v34 = vpop.xlane.xlu1 %1620 }
 0xb1b   : > { %v1625_v35 = vmul.f32 0.03125, %v1621_v34 }
 0xb1c   : > { %v1624_v36 = vpop.xlane.xlu0 %1623 }
 0xb1d   : > { %v1627_v37 = vadd.f32 1e-12, %v1625_v35  ;;  %v1626_v38 = vmul.f32 0.03125, %v1624_v36 }
 0xb1f   : > { %3178 = vrsqrt.f32 %v1627_v37  ;;  %v1628_v39 = vadd.f32 1e-12, %v1626_v38 }
 0xb21   : > { %3180 = vrsqrt.f32 %v1628_v39 }
 0xb29   : > { %v3179_v40 = vpop.eup %3178 }
 0xb2a   : > { %v1631_v42 = vmul.f32 %v3179_v40, %v1615_v23 }
 0xb2b   : > { %v3181_v43 = vpop.eup %3180 }
 0xb2c   : > { %v1639_v44 = vmul.f32 %v2763_v41, %v1631_v42  ;;  %v1632_v45 = vmul.f32 %v3181_v43, %v1616_v25 }
 0xb2e   : > { %v1640_v47 = vmul.f32 %v2763_v41, %v1632_v45  ;;  %v3532_v48 = vadd.f32 %v2764_v46, %v1639_v44 }
 0xb30   : > { %v3534_v49 = vadd.f32 %v2764_v46, %v1640_v47 }
 0xb32   : > { %v1649_v51 = vpack.c.bf16 %v3534_v49, %v3532_v48 }
 0xb34   : > { %2965 = vmatmul.mubr.msk.bf16.vlgmr.msra.gmra.mrb[16].mxu1 %vm793_vm0, %v1649_v51 }
 0xc07   : > { %v1712_v53 = vpop.f32.mrb[16].mxu1 }
 0xc08   : > { %v1713_v54 = vadd.f32 %v2770_v52, %v1712_v53  ;;  %v2966_v57 = vpop.f32.mrb[17].mxu1 }
 0xc09   : > { %v1715_v58 = vpop.f32.mrb[18].mxu1 }
 0xc0a   : > { %v1716_v59 = vadd.f32 %v2770_v52, %v1715_v58  ;;  %v2967_v60 = vpop.f32.mrb[19].mxu1  ;;  %v1719_v61 = vmul.f32 0.25, %v1713_v54 }
 0xc0c   : > { %2972 = vmatprep.mubr.msk.f32.mxu1 %vm913_vm2, %v1719_v61  ;;  %v3541_v62 = vpack.i.bf16 %v1716_v59, %v1713_v54  ;;  %v1720_v63 = vmul.f32 0.25, %v1716_v59 }
 0xc0e   : > { %3111 = vrot.lane.b32.xlu0 %v3541_v62, %s3668_s2  ;;  %3106 = vrot.lane.b32.xlu1 %v3541_v62, %s3669_s27 }
 0xc12   : > { %1921 = vrot.lane.b32.xlu1 %v1719_v61, %s3670_s28 }
 0xc16   : > { %1923 = vrot.lane.b32.xlu1 %v1720_v63, %s3670_s28 }
 0xc80   : > { %v3112_v0 = vpop.permute.xlu0 %3111  ;;  %v3107_v1 = vpop.permute.xlu1 %3106 }
 0xc81   : > { %v3114_v2 = vunpack.i.h.bf16 %v3112_v0  ;;  %v3113_v3 = vunpack.i.l.bf16 %v3112_v0  ;;  %v3109_v4 = vunpack.i.h.bf16 %v3107_v1  ;;  %v3108_v5 = vunpack.i.l.bf16 %v3107_v1  ;;  %v3142_v1 = vld [vmem:[%s3349_s26 + $0x10] sm:$0xff]  }
 0xc83   : > { %v3054_v6 = vpack.c.bf16 %v3114_v2, %v3113_v3  ;;  %v3044_v7 = vpack.c.bf16 %v3109_v4, %v3108_v5  ;;  %v3143_v2 = vld [vmem:[%s3349_s26 + $0x18] sm:$0xff]  }
 0xc84   : > { %v1922_v8 = vpop.permute.xlu1 %1921 }
 0xc85   : > { %3046 = vmatprep.subr.msk.bf16.mxu1 %vm3396_vm3, %v3044_v7  ;;  %3056 = vmatprep.subr.msk.bf16.mxu0 %vm3396_vm3, %v3054_v6 }
 0xc86   : > { %2986 = vmatprep.mubr.msk.f32.mxu0 %vm913_vm2, %v1922_v8  ;;  %3049 = vmatpush3.bf16.xpose.msk.msra.mxu1 %vm3396_vm3, %v3044_v7 }
 0xc87   : > { %3059 = vmatpush3.bf16.xpose.msk.msra.mxu0 %vm3396_vm3, %v3054_v6 }
 0xc88   : > { %2996 = vmatprep.subr.bf16.mxu0 %v3218_v15  ;;  %v1924_v9 = vpop.permute.xlu1 %1923 }
 0xc8d   : > { %2973 = vmatmul.mubr.msk.f32.vlgmr.msra.gmra.mrb[10].mxu1 %vm913_vm2, %v1720_v63 }
 0xc8e   : > { %2987 = vmatmul.mubr.msk.f32.vlgmr.msra.gmra.mrb[2].mxu0 %vm913_vm2, %v1924_v9 }
 0xc8f   : > { %3000 = vmatprep.mubr.msk.bf16.mxu0 %vm3219_vm1, %v3218_v15  ;;  %2997 = vmatpush3.bf16.msra.mxu0 %v3142_v1 }
 0xc90   : > { %2998 = vmatprep.subr.bf16.mxu0 %v3218_v15 }
 0xc93   : > { %2999 = vmatpush3.bf16.msra.mxu0 %v3143_v2 }
 0xc94   : > { %3012 = vmatprep.subr.bf16.mxu0 %v3218_v15 }
 0xd60   : > { %v2974_v10 = vpop.f32.mrb[10].mxu1 }
 0xd61   : > { %v1809_v11 = vadd.f32 %v2974_v10, %v3418_v55  ;;  %v2988_v12 = vpop.f32.mrb[2].mxu0  ;;  %v1803_v13 = vpop.f32.mrb[11].mxu1 }
 0xd62   : > { %v1804_v14 = vadd.f32 %v1803_v13, %v3420_v56  ;;  %v2003_v16 = vpop.f32.mrb[3].mxu0  ;;  %v2009_v19 = vadd.f32 %v2988_v12, %v3418_v55 }
 0xd63   : > { %v2004_v50 = vadd.f32 %v2003_v16, %v3420_v56  ;;  %v1815_v17 = vsel %vm913_vm2, %v1809_v11, -inf }
 0xd64   : > { %1816 = vmax.xlane.f32.xlu0 %v1815_v17  ;;  %v1812_v18 = vsel %vm913_vm2, %v1804_v14, -inf  ;;  %v2015_v20 = vsel %vm913_vm2, %v2009_v19, -inf }
 0xd65   : > { %1813 = vmax.xlane.f32.xlu1 %v1812_v18  ;;  %v2012_v31 = vsel %vm913_vm2, %v2004_v50, -inf }
 0xd68   : > { %2013 = vmax.xlane.f32.xlu0 %v2012_v31 }
 0xd6c   : > { %2016 = vmax.xlane.f32.xlu0 %v2015_v20 }
 0xdf1   : > { %v1817_v32 = vpop.xlane.xlu0 %1816 }
 0xdf2   : > { %v1819_v21 = vsub.f32 %v1809_v11, %v1817_v32  ;;  %v1814_v22 = vpop.xlane.xlu1 %1813 }
 0xdf3   : > { %v1818_v23 = vsub.f32 %v1804_v14, %v1814_v22  ;;  %v2791_v14 = vld [vmem:[%s3459_s24 + $0x1] ss:$0 sm:$0xff] }
 0xdf4   : > { %v1822_v24 = vmul.f32 1.442695, %v1819_v21 }
 0xdf5   : > { %v1820_v56 = vmul.f32 1.442695, %v1818_v23  ;;  %v2014_v25 = vpop.xlane.xlu0 %2013 }
 0xdf6   : > { %3182 = vpow2.f32 %v1822_v24  ;;  %v2018_v26 = vsub.f32 %v2004_v50, %v2014_v25 }
 0xdf7   : > { %3184 = vpow2.f32 %v1820_v56 }
 0xdf8   : > { %v2020_v27 = vmul.f32 1.442695, %v2018_v26 }
 0xdf9   : > { %v2017_v28 = vpop.xlane.xlu0 %2016 }
 0xdfa   : > { %3186 = vpow2.f32 %v2020_v27  ;;  %v2019_v55 = vsub.f32 %v2009_v19, %v2017_v28 }
 0xdfc   : > { %v2022_v29 = vmul.f32 1.442695, %v2019_v55 }
 0xdfe   : > { %3188 = vpow2.f32 %v2022_v29 }
 0xe00   : > { %v3183_v30 = vpop.eup %3182 }
 0xe01   : > { %v3185_v33 = vpop.eup %3184  ;;  %v1827_v34 = vsel %vm913_vm2, %v3183_v30, 0.0 }
 0xe02   : > { %1828 = vadd.xlane.f32.xlu0 %v1827_v34  ;;  %v1824_v35 = vsel %vm913_vm2, %v3185_v33, 0.0 }
 0xe03   : > { %1825 = vadd.xlane.f32.xlu1 %v1824_v35 }
 0xe04   : > { %v3187_v36 = vpop.eup %3186 }
 0xe05   : > { %v2024_v37 = vsel %vm913_vm2, %v3187_v36, 0.0 }
 0xe07   : > { %2025 = vadd.xlane.f32.xlu1 %v2024_v37 }
 0xe08   : > { %v3189_v38 = vpop.eup %3188 }
 0xe09   : > { %v2027_v39 = vsel %vm913_vm2, %v3189_v38, 0.0 }
 0xe0a   : > { %2028 = vadd.xlane.f32.xlu0 %v2027_v39 }
 0xe18   : > { %3116 = vrot.lane.b32.xlu1 %v3541_v62, %s3671_s17 }
 0xe20   : > { %3121 = vrot.lane.b32.xlu0 %v3541_v62, %s3672_s18 }
 0xe8f   : > { %v1829_v40 = vpop.xlane.xlu0 %1828 }
 0xe90   : > { %v1826_v41 = vpop.xlane.xlu1 %1825 }
 0xe91   : > { %3190 = vrcp.f32 %v1826_v41 }
 0xe92   : > { %3192 = vrcp.f32 %v1829_v40  ;;  %v2797_v40 = vld [vmem:[%s3476_s25 + $0x1] ss:$0 sm:$0xff] }
 0xe94   : > { %v2026_v42 = vpop.xlane.xlu1 %2025 }
 0xe95   : > { %3194 = vrcp.f32 %v2026_v42 }
 0xe97   : > { %v2029_v43 = vpop.xlane.xlu0 %2028 }
 0xe98   : > { %3196 = vrcp.f32 %v2029_v43  ;;  %v3117_v44 = vpop.permute.xlu1 %3116 }
 0xe99   : > { %v3119_v45 = vunpack.i.h.bf16 %v3117_v44  ;;  %v3118_v46 = vunpack.i.l.bf16 %v3117_v44 }
 0xe9b   : > { %v3191_v47 = vpop.eup %3190  ;;  %v3050_v51 = vpack.c.bf16 %v3119_v45, %v3118_v46  ;;  %v3122_v52 = vpop.permute.xlu0 %3121  ;;  %v2798_v45 = vld [vmem:[%s3483_s22 + $0x1] ss:$0 sm:$0xff] }
 0xe9c   : > { %v3193_v53 = vpop.eup %3192  ;;  %v3124_v54 = vunpack.i.h.bf16 %v3122_v52  ;;  %v3123_v57 = vunpack.i.l.bf16 %v3122_v52  ;;  %v1832_v58 = vmul.f32 %v3191_v47, %v3185_v33 }
 0xe9d   : > { %3051 = vmatprep.subr.bf16.mxu1 %v3050_v51  ;;  %v1833_v61 = vmul.f32 %v3193_v53, %v3183_v30  ;;  %v3145_v30 = vld [vmem:[%s3354_s29 + $0x18] sm:$0xff]   ;;  %v3146_v53 = vld [vmem:[%s3332_s0 + $0x20] sm:$0xff]  }
 0xe9e   : > { %v3060_v59 = vpack.c.bf16 %v3124_v54, %v3123_v57  ;;  %3053 = vmatpush3.bf16.msra.mxu1 %v3050_v51  ;;  %2979 = vmatprep.mubr.msk.f32.mxu1 %vm913_vm2, %v1832_v58  ;;  %v3147_v54 = vld [vmem:[%s3332_s0 + $0x28] sm:$0xff]   ;;  %v3148_v57 = vld [vmem:[%s3332_s0 + $0x30] sm:$0xff]   ;;  %v3149_v58 = vld [vmem:[%s3332_s0 + $0x38] sm:$0xff]  }
 0xe9f   : > { %v3195_v60 = vpop.eup %3194 }
 0xea0   : > { %3061 = vmatprep.subr.bf16.mxu1 %v3060_v59  ;;  %v2032_v62 = vmul.f32 %v3195_v60, %v3187_v36 }
 0xea1   : > { %2980 = vmatmul.mubr.msk.f32.vlgmr.msra.gmra.mrb[20].mxu1 %vm913_vm2, %v1833_v61 }
 0xea2   : > { %v3197_v63 = vpop.eup %3196  ;;  %3063 = vmatpush3.bf16.msra.mxu1 %v3060_v59  ;;  %2993 = vmatprep.mubr.msk.f32.mxu1 %vm913_vm2, %v2032_v62  ;;  %v2804_v59 = vld [vmem:[%s3500_s30 + $0x1] ss:$0 sm:$0xff] }
 0xea3   : > { %v2033_v0 = vmul.f32 %v3197_v63, %v3189_v38  ;;  %3004 = vmatprep.subr.bf16.mxu1 %v3218_v15 }
 0xea5   : > { %2994 = vmatmul.mubr.msk.f32.vlgmr.msra.gmra.mrb[22].mxu1 %vm913_vm2, %v2033_v0 }
 0xea6   : > { %3008 = vmatprep.mubr.msk.bf16.mxu1 %vm3219_vm1, %v3218_v15 }
 0xf74   : > { %v2981_v3 = vpop.f32.mrb[20].mxu1 }
 0xf75   : > { %v1912_v4 = vpop.f32.mrb[21].mxu1 }
 0xf78   : > { %v2995_v5 = vpop.f32.mrb[22].mxu1 }
 0xf79   : > { %v2112_v6 = vpop.f32.mrb[23].mxu1 }
 0xf7a   : > { %v3125_v7 = vpack.i.bf16 %v2995_v5, %v2112_v6 }
 0xf7c   : > { %3126 = vrot.lane.b32.xlu1 %v3125_v7, %s3673_s20 }
 0xfee   : > { %v3127_v8 = vpop.permute.xlu1 %3126 }
 0xfef   : > { %v3129_v9 = vunpack.i.h.bf16 %v3127_v8  ;;  %v3128_v10 = vunpack.i.l.bf16 %v3127_v8 }
 0xff1   : > { %v2130_v11 = vsel %vm913_vm2, %v2981_v3, %v3129_v9  ;;  %v2129_v12 = vsel %vm913_vm2, %v1912_v4, %v3128_v10 }
 0xff2   : > { %v2131_v13 = vpack.c.bf16 %v2130_v11, %v2129_v12 }
 0xff4   : > { %3001 = vmatmul.mubr.msk.bf16.vlgmr.msra.gmra.mrb[12].mxu0 %vm793_vm0, %v2131_v13 }
 0xff5   : > { %3020 = vmatprep.mubr.msk.bf16.mxu0 %vm3219_vm1, %v3218_v15  ;;  %3013 = vmatpush3.bf16.msra.mxu0 %v3146_v53 }
 0xff6   : > { %3014 = vmatprep.subr.bf16.mxu0 %v3218_v15 }
 0xff9   : > { %3015 = vmatpush3.bf16.msra.mxu0 %v3147_v54 }
 0xffa   : > { %3016 = vmatprep.subr.bf16.mxu0 %v3218_v15 }
 0xffd   : > { %3017 = vmatpush3.bf16.msra.mxu0 %v3148_v57 }
 0xffe   : > { %3018 = vmatprep.subr.bf16.mxu0 %v3218_v15 }
0x1001   : > { %3019 = vmatpush3.bf16.msra.mxu0 %v3149_v58 }
0x10c7   : > { %v2194_v16 = vpop.f32.mrb[12].mxu0 }
0x10c8   : > { %v2195_v50 = vadd.f32 %v2791_v14, %v2194_v16  ;;  %v3002_v17 = vpop.f32.mrb[13].mxu0 }
0x10c9   : > { %v2197_v18 = vpop.f32.mrb[14].mxu0 }
0x10ca   : > { %v2198_v19 = vadd.f32 %v2791_v14, %v2197_v18  ;;  %v3003_v31 = vpop.f32.mrb[15].mxu0  ;;  %v2201_v20 = vadd.f32 %v2195_v50, %v3532_v48 }
0x10cb   : > { %v2817_v31 = vld [vmem:[%s3508_s19 + $0x1] ss:$0 sm:$0xff] }
0x10cc   : > { %v2207_v32 = vsel %vm793_vm0, %v2201_v20, 0.0  ;;  %v2202_v21 = vadd.f32 %v2198_v19, %v3534_v49  ;;  %v3144_v49 = vld [vmem:[%s3354_s29 + $0x10] sm:$0xff]   ;;  %s785_s29 = scalar_lea.vmem %s3650_s16, %s3322_s23 }
0x10cd   : > { %2208 = vadd.xlane.f32.xlu1 %v2207_v32  ;;  %3005 = vmatpush3.bf16.msra.mxu1 %v3144_v49 }
0x10ce   : > { %v2210_v22 = vsel %vm793_vm0, %v2202_v21, 0.0  ;;  %3006 = vmatprep.subr.bf16.mxu1 %v3218_v15 }
0x10cf   : > { %2211 = vadd.xlane.f32.xlu0 %v2210_v22 }
0x10d1   : > { %3007 = vmatpush3.bf16.msra.mxu1 %v3145_v30 }
0x115a   : > { %v2209_v23 = vpop.xlane.xlu1 %2208 }
0x115b   : > { %v2213_v24 = vmul.f32 0.03125, %v2209_v23 }
0x115c   : > { %v2212_v56 = vpop.xlane.xlu0 %2211 }
0x115d   : > { %v2215_v25 = vsub.f32 %v2201_v20, %v2213_v24  ;;  %v2214_v26 = vmul.f32 0.03125, %v2212_v56 }
0x115f   : > { %v2216_v27 = vsub.f32 %v2202_v21, %v2214_v26  ;;  %v2217_v28 = vmul.f32 %v2215_v25, %v2215_v25 }
0x1161   : > { %v2219_v55 = vsel %vm793_vm0, %v2217_v28, 0.0  ;;  %v2218_v48 = vmul.f32 %v2216_v27, %v2216_v27 }
0x1162   : > { %2220 = vadd.xlane.f32.xlu0 %v2219_v55 }
0x1163   : > { %v2222_v29 = vsel %vm793_vm0, %v2218_v48, 0.0 }
0x1164   : > { %2223 = vadd.xlane.f32.xlu1 %v2222_v29 }
0x11ef   : > { %v2221_v33 = vpop.xlane.xlu0 %2220 }
0x11f0   : > { %v2225_v34 = vmul.f32 0.03125, %v2221_v33 }
0x11f1   : > { %v2224_v35 = vpop.xlane.xlu1 %2223 }
0x11f2   : > { %v2227_v36 = vadd.f32 1e-12, %v2225_v34  ;;  %v2226_v37 = vmul.f32 0.03125, %v2224_v35 }
0x11f4   : > { %3198 = vrsqrt.f32 %v2227_v36  ;;  %v2228_v38 = vadd.f32 1e-12, %v2226_v37 }
0x11f6   : > { %3200 = vrsqrt.f32 %v2228_v38 }
0x11fe   : > { %v3199_v39 = vpop.eup %3198 }
0x11ff   : > { %v2231_v41 = vmul.f32 %v3199_v39, %v2215_v25 }
0x1200   : > { %v3201_v42 = vpop.eup %3200 }
0x1201   : > { %v2239_v43 = vmul.f32 %v2797_v40, %v2231_v41  ;;  %v2232_v44 = vmul.f32 %v3201_v42, %v2216_v27 }
0x1203   : > { %v2240_v46 = vmul.f32 %v2797_v40, %v2232_v44  ;;  %v2247_v47 = vadd.f32 %v2798_v45, %v2239_v43  ;;  %v2825_v44 = vld [vmem:[%s3522_s1 + $0x1] ss:$0 sm:$0xff] }
0x1205   : > { %v2248_v51 = vadd.f32 %v2798_v45, %v2240_v46 }
0x1207   : > { %v2249_v52 = vpack.c.bf16 %v2248_v51, %v2247_v47 }
0x1209   : > { %3009 = vmatmul.mubr.msk.bf16.vlgmr.msra.gmra.mrb[24].mxu1 %vm793_vm0, %v2249_v52 }
0x12dc   : > { %v2312_v60 = vpop.f32.mrb[24].mxu1 }
0x12dd   : > { %v2313_v61 = vadd.f32 %v2804_v59, %v2312_v60  ;;  %v3010_v62 = vpop.f32.mrb[25].mxu1 }
0x12de   : > { %v2315_v63 = vpop.f32.mrb[26].mxu1 }
0x12df   : > { %v2321_v0 = vmul.f32 0.044715, %v2313_v61  ;;  %v2316_v1 = vadd.f32 %v2804_v59, %v2315_v63  ;;  %v3011_v2 = vpop.f32.mrb[27].mxu1  ;;  %v2319_v14 = vmul.f32 0.5, %v2313_v61 }
0x12e1   : > { %v2323_v3 = vmul.f32 %v2321_v0, %v2313_v61  ;;  %v2322_v4 = vmul.f32 0.044715, %v2316_v1  ;;  %v2320_v16 = vmul.f32 0.5, %v2316_v1 }
0x12e3   : > { %v2325_v5 = vmul.f32 %v2323_v3, %v2313_v61  ;;  %v2324_v6 = vmul.f32 %v2322_v4, %v2316_v1 }
0x12e5   : > { %v2327_v7 = vadd.f32 %v2325_v5, %v2313_v61  ;;  %v2326_v8 = vmul.f32 %v2324_v6, %v2316_v1 }
0x12e7   : > { %v2329_v9 = vmul.f32 0.7978846, %v2327_v7  ;;  %v2328_v10 = vadd.f32 %v2326_v8, %v2316_v1 }
0x12e9   : > { %3202 = vtanh.f32 %v2329_v9  ;;  %v2330_v15 = vmul.f32 0.7978846, %v2328_v10 }
0x12eb   : > { %3204 = vtanh.f32 %v2330_v15 }
0x12f3   : > { %v3203_v11 = vpop.eup %3202 }
0x12f4   : > { %v2333_v12 = vadd.f32 1.0, %v3203_v11 }
0x12f5   : > { %v3205_v13 = vpop.eup %3204 }
0x12f6   : > { %v2334_v50 = vadd.f32 1.0, %v3205_v13  ;;  %v2335_v17 = vmul.f32 %v2333_v12, %v2319_v14 }
0x12f8   : > { %v2336_v18 = vmul.f32 %v2334_v50, %v2320_v16 }
0x12fa   : > { %v2337_v19 = vpack.c.bf16 %v2336_v18, %v2335_v17 }
0x12fc   : > { %3021 = vmatmul.mubr.msk.bf16.vlgmr.msra.gmra.mrb[16].mxu0 %vm1558_vm4, %v2337_v19 }
0x13cf   : > { %v2416_v20 = vpop.f32.mrb[16].mxu0 }
0x13d0   : > { %v2417_v32 = vadd.f32 %v2817_v31, %v2416_v20  ;;  %v3022_v21 = vpop.f32.mrb[17].mxu0 }
0x13d1   : > { %v2419_v22 = vpop.f32.mrb[18].mxu0 }
0x13d2   : > { %v2420_v23 = vadd.f32 %v2817_v31, %v2419_v22  ;;  %v3023_v24 = vpop.f32.mrb[19].mxu0  ;;  %v2423_v56 = vadd.f32 %v2417_v32, %v2247_v47  ;;  %v2826_v47 = vld [vmem:[%s3529_s3 + $0x1] ss:$0 sm:$0xff] }
0x13d4   : > { %v2429_v25 = vsel %vm793_vm0, %v2423_v56, 0.0  ;;  %v2424_v26 = vadd.f32 %v2420_v23, %v2248_v51 }
0x13d5   : > { %2430 = vadd.xlane.f32.xlu0 %v2429_v25 }
0x13d6   : > { %v2432_v27 = vsel %vm793_vm0, %v2424_v26, 0.0 }
0x13d7   : > { %2433 = vadd.xlane.f32.xlu1 %v2432_v27 }
0x1462   : > { %v2431_v28 = vpop.xlane.xlu0 %2430 }
0x1463   : > { %v2435_v55 = vmul.f32 0.03125, %v2431_v28 }
0x1464   : > { %v2434_v48 = vpop.xlane.xlu1 %2433 }
0x1465   : > { %v2437_v29 = vsub.f32 %v2423_v56, %v2435_v55  ;;  %v2436_v49 = vmul.f32 0.03125, %v2434_v48 }
0x1467   : > { %v2438_v30 = vsub.f32 %v2424_v26, %v2436_v49  ;;  %v2439_v33 = vmul.f32 %v2437_v29, %v2437_v29 }
0x1469   : > { %v2441_v34 = vsel %vm793_vm0, %v2439_v33, 0.0  ;;  %v2440_v35 = vmul.f32 %v2438_v30, %v2438_v30 }
0x146a   : > { %2442 = vadd.xlane.f32.xlu0 %v2441_v34 }
0x146b   : > { %v2444_v36 = vsel %vm793_vm0, %v2440_v35, 0.0 }
0x146c   : > { %2445 = vadd.xlane.f32.xlu1 %v2444_v36 }
0x14f7   : > { %v2443_v37 = vpop.xlane.xlu0 %2442 }
0x14f8   : > { %v2447_v38 = vmul.f32 0.03125, %v2443_v37 }
0x14f9   : > { %v2446_v39 = vpop.xlane.xlu1 %2445 }
0x14fa   : > { %v2449_v40 = vadd.f32 1e-12, %v2447_v38  ;;  %v2448_v41 = vmul.f32 0.03125, %v2446_v39 }
0x14fc   : > { %3206 = vrsqrt.f32 %v2449_v40  ;;  %v2450_v42 = vadd.f32 1e-12, %v2448_v41 }
0x14fe   : > { %3208 = vrsqrt.f32 %v2450_v42 }
0x1506   : > { %v3207_v43 = vpop.eup %3206 }
0x1507   : > { %v2453_v45 = vmul.f32 %v3207_v43, %v2437_v29 }
0x1508   : > { %v3209_v46 = vpop.eup %3208 }
0x1509   : > { %v2461_v51 = vmul.f32 %v2825_v44, %v2453_v45  ;;  %v2454_v52 = vmul.f32 %v3209_v46, %v2438_v30 }
0x150b   : > { %v2469_v53 = vadd.f32 %v2826_v47, %v2461_v51  ;;  %v2462_v54 = vmul.f32 %v2825_v44, %v2454_v52 }
0x150d   : > { %2471 = vst.msk [vmem:[%s785_s29] sm:$0xff] %vm793_vm0, %v2469_v53  ;;  %v2470_v57 = vadd.f32 %v2826_v47, %v2462_v54 }
0x150f   : > { %2472 = vst.msk [vmem:[%s785_s29 + $0x8] sm:$0xff] %vm793_vm0, %v2470_v57 }
0x1510 PF: > { %s26_s21 = sadd.s32 1, %s3216_s21  }
0x1511   : > { %p23_p4 = scmp.ge.s32.totalorder %s26_s21, 4  }
0x1513   :  { %25 = sbr.rel (!%p23_p4) target bundleno = 5 (0x5), region = 171 }

</bundles_post_ra>
